<compile_context>
chip_gen: v7x
topology: tpu7x:2x2x1
jax: 0.10.0
libtpu: 0.0.40
codegen_flags: <defaults>
</compile_context>

<pallas_src>
import functools

import numpy as np

import jax
import jax.numpy as jnp
from jax.experimental import pallas as pl
from jax.experimental.pallas import tpu as pltpu


_TAPS = tuple((dy, dx) for dy in (-1, 0, 1) for dx in (-1, 0, 1))
_CHANNELS = [64, 32, 16, 8, 3]  # decoder: 64 -> 32 -> 16 -> 8 -> 3


def _fused_decoder_kernel(H, W, n_layers, *refs):
    """refs = (x, masks, w1, b1, ..., wL, bL, out).

    x_ref    : (1, C0, H*W)      f32  input image, CHW-flat (pixels on lanes)
    masks_ref: (9, 1, H*W)       f32  0/1 in-bounds mask per 3x3 tap
    wi_ref   : (Cout_i, 9*Cin_i) f32  packed im2col weights (col = tap*Cin+cin)
    bi_ref   : (Cout_i, 1)       f32
    out_ref  : (1, Cout_L, H*W)  f32
    """
    P = H * W
    x_ref = refs[0]
    masks_ref = refs[1]
    out_ref = refs[-1]
    wb_refs = refs[2:-1]

    # Load the 9 tap masks from VMEM once; reused by every layer.
    tap_masks = [masks_ref[t] for t in range(9)]        # each (1, P)

    a = x_ref[0]                                        # (C0, P)

    for layer in range(n_layers):
        w_ref = wb_refs[2 * layer]
        b_ref = wb_refs[2 * layer + 1]

        # Build im2col matrix (9*Cin, P): lane-roll each tap into place and
        # zero the out-of-image halo with a precomputed 0/1 mask (no padding,
        # no unaligned slices; rolls go to the XLU, masks to the VPU, both
        # co-issue with the MXU matmul of the previous layer).
        cols = []
        for t, (dy, dx) in enumerate(_TAPS):
            s = dy * W + dx
            shifted = a if s == 0 else pltpu.roll(a, shift=(-s) % P, axis=1)
            if dy == 0 and dx == 0:
                cols.append(shifted)                    # center tap: in-bounds
            else:
                cols.append(shifted * tap_masks[t])
        patches = jnp.concatenate(cols, axis=0)         # (9*Cin, P)

        acc = jnp.dot(w_ref[...], patches,
                      preferred_element_type=jnp.float32)   # (Cout, P)
        acc = acc + b_ref[...]                               # (Cout,1) bcast
        if layer < n_layers - 1:
            acc = jnp.maximum(acc, 0.0)
        a = acc

    out_ref[0] = a.astype(out_ref.dtype)


def _boundary_masks(H, W):
    """(9, 1, H*W) f32: mask[t, 0, y*W+x] = 1 iff pixel (y+dy, x+dx) is inside."""
    y = np.arange(H)[:, None]
    x = np.arange(W)[None, :]
    rows = []
    for dy, dx in _TAPS:
        valid = ((y + dy >= 0) & (y + dy < H) &
                 (x + dx >= 0) & (x + dx < W))
        rows.append(valid.reshape(1, H * W))
    return jnp.asarray(np.stack(rows, axis=0).astype(np.float32))


def _pack_conv_weight(w_oihw):
    """(Cout, Cin, 3, 3) OIHW -> (Cout, 9*Cin) with column = tap*Cin + cin."""
    cout, cin, kh, kw = w_oihw.shape
    return jnp.transpose(w_oihw, (0, 2, 3, 1)).reshape(cout, kh * kw * cin)


def simplenet_forward(x_nchw, params):
    """SimpleNet.forward (the 4-conv decoder). Input/output are NCHW float32."""
    N, C0, H, W = x_nchw.shape
    P = H * W
    n_layers = len(params)
    cout_last = params[-1][0].shape[0]

    # TODO(synk): for large H*W add an H-row grid axis with a 1-row halo
    # (and vmem_limit_bytes) instead of holding the whole image per core.
    assert P % 128 == 0, "H*W must be lane-aligned (128); add row tiling otherwise"
    vmem_bytes = (C0 * P + 9 * C0 * P + 9 * P) * 4
    assert vmem_bytes < 8 * 1024 * 1024, "add row tiling for this input size"

    x_flat = x_nchw.reshape(N, C0, P)
    masks = _boundary_masks(H, W)

    inputs = [x_flat, masks]
    in_specs = [
        pl.BlockSpec((1, C0, P), lambda n: (n, 0, 0)),
        pl.BlockSpec((9, 1, P), lambda n: (0, 0, 0)),
    ]
    flops = 0
    for w, b in params:
        cout, cin = w.shape[0], w.shape[1]
        inputs += [_pack_conv_weight(w), b.reshape(cout, 1)]
        in_specs += [
            pl.BlockSpec((cout, 9 * cin), lambda n: (0, 0)),
            pl.BlockSpec((cout, 1), lambda n: (0, 0)),
        ]
        flops += 2 * N * P * 9 * cin * cout

    bytes_accessed = sum(int(np.prod(a.shape)) * 4 for a in inputs) + N * cout_last * P * 4

    kernel = functools.partial(_fused_decoder_kernel, H, W, n_layers)
    out_flat = pl.pallas_call(
        kernel,
        out_shape=jax.ShapeDtypeStruct((N, cout_last, P), jnp.float32),
        grid=(N,),
        in_specs=in_specs,
        out_specs=pl.BlockSpec((1, cout_last, P), lambda n: (n, 0, 0)),
        compiler_params=pltpu.CompilerParams(
            dimension_semantics=("parallel",)),
        cost_estimate=pl.CostEstimate(
            flops=flops, transcendentals=0, bytes_accessed=bytes_accessed),
    )(*inputs)
    return out_flat.reshape(N, cout_last, H, W)


# ---------------- parameter construction (deterministic, synthetic) ----------

def init_params(key):
    params = []
    for cin, cout in zip(_CHANNELS[:-1], _CHANNELS[1:]):
        kw_, kb_, key = jax.random.split(key, 3)
        bound = 1.0 / np.sqrt(cin * 3 * 3)
        w = jax.random.uniform(kw_, (cout, cin, 3, 3), jnp.float32,
                               minval=-bound, maxval=bound)   # OIHW (PyTorch)
        b = jax.random.uniform(kb_, (cout,), jnp.float32,
                               minval=-bound, maxval=bound)
        params.append((w, b))
    return params


# ---------------- reference (plain JAX / XLA) for the sanity check -----------

def reference_forward(x_nchw, params):
    x = x_nchw
    n_layers = len(params)
    for i, (w, b) in enumerate(params):
        x = jax.lax.conv_general_dilated(
            x, w, window_strides=(1, 1), padding="SAME",
            dimension_numbers=("NCHW", "OIHW", "NCHW"))
        x = x + b.reshape(1, -1, 1, 1)
        if i < n_layers - 1:
            x = jnp.maximum(x, 0.0)
    return x


if __name__ == "__main__":
    key = jax.random.PRNGKey(0)
    kx, kp = jax.random.split(key)

    # Small shapes consistent with the module: the decoder requires 64 input channels.
    N, C, H, W = 2, 64, 16, 16
    x = jax.random.normal(kx, (N, C, H, W), jnp.float32)
    params = init_params(kp)

    fwd = jax.jit(simplenet_forward)
    out = jax.block_until_ready(fwd(x, params))
    assert out.shape == (N, 3, H, W), out.shape

    ref = jax.block_until_ready(reference_forward(x, params))
    max_err = float(jnp.max(jnp.abs(out - ref)))
    assert jnp.allclose(out, ref, rtol=1e-3, atol=1e-3), max_err

    print("KERNEL_OK")
</pallas_src>

<mosaic_0001>
module attributes {stable_mosaic.version = 11 : i64} {
  func.func @_fused_decoder_kernel(%arg0: i32, %arg1: memref<1x64x256xf32, #tpu.memory_space<vmem>>, %arg2: memref<9x1x256xf32, #tpu.memory_space<vmem>>, %arg3: memref<32x576xf32, #tpu.memory_space<vmem>>, %arg4: memref<32x1xf32, #tpu.memory_space<vmem>>, %arg5: memref<16x288xf32, #tpu.memory_space<vmem>>, %arg6: memref<16x1xf32, #tpu.memory_space<vmem>>, %arg7: memref<8x144xf32, #tpu.memory_space<vmem>>, %arg8: memref<8x1xf32, #tpu.memory_space<vmem>>, %arg9: memref<3x72xf32, #tpu.memory_space<vmem>>, %arg10: memref<3x1xf32, #tpu.memory_space<vmem>>, %arg11: memref<1x3x256xf32, #tpu.memory_space<vmem>>) attributes {dimension_semantics = [#tpu.dimension_semantics<parallel>], iteration_bounds = array<i64: 2>, scalar_prefetch = 0 : i64, scratch_operands = 0 : i64, tpu.core_type = #tpu.core_type<tc>, window_params = [{transform_indices = @transform_0, window_bounds = array<i64: 1, 64, 256>}, {pipeline_mode = #tpu.pipeline_mode<synchronous>, transform_indices = @transform_1, window_bounds = array<i64: 9, 1, 256>}, {pipeline_mode = #tpu.pipeline_mode<synchronous>, transform_indices = @transform_2, window_bounds = array<i64: 32, 576>}, {pipeline_mode = #tpu.pipeline_mode<synchronous>, transform_indices = @transform_3, window_bounds = array<i64: 32, 1>}, {pipeline_mode = #tpu.pipeline_mode<synchronous>, transform_indices = @transform_4, window_bounds = array<i64: 16, 288>}, {pipeline_mode = #tpu.pipeline_mode<synchronous>, transform_indices = @transform_5, window_bounds = array<i64: 16, 1>}, {pipeline_mode = #tpu.pipeline_mode<synchronous>, transform_indices = @transform_6, window_bounds = array<i64: 8, 144>}, {pipeline_mode = #tpu.pipeline_mode<synchronous>, transform_indices = @transform_7, window_bounds = array<i64: 8, 1>}, {pipeline_mode = #tpu.pipeline_mode<synchronous>, transform_indices = @transform_8, window_bounds = array<i64: 3, 72>}, {pipeline_mode = #tpu.pipeline_mode<synchronous>, transform_indices = @transform_9, window_bounds = array<i64: 3, 1>}, {transform_indices = @transform_10, window_bounds = array<i64: 1, 3, 256>}]} {
    %c0 = arith.constant 0 : index
    %c0_0 = arith.constant 0 : index
    %c0_1 = arith.constant 0 : index
    %0 = vector.load %arg2[%c0, %c0_0, %c0_1] : memref<9x1x256xf32, #tpu.memory_space<vmem>>, vector<1x1x256xf32>
    %1 = vector.shape_cast %0 : vector<1x1x256xf32> to vector<1x256xf32>
    %c1 = arith.constant 1 : index
    %c0_2 = arith.constant 0 : index
    %c0_3 = arith.constant 0 : index
    %2 = vector.load %arg2[%c1, %c0_2, %c0_3] : memref<9x1x256xf32, #tpu.memory_space<vmem>>, vector<1x1x256xf32>
    %3 = vector.shape_cast %2 : vector<1x1x256xf32> to vector<1x256xf32>
    %c2 = arith.constant 2 : index
    %c0_4 = arith.constant 0 : index
    %c0_5 = arith.constant 0 : index
    %4 = vector.load %arg2[%c2, %c0_4, %c0_5] : memref<9x1x256xf32, #tpu.memory_space<vmem>>, vector<1x1x256xf32>
    %5 = vector.shape_cast %4 : vector<1x1x256xf32> to vector<1x256xf32>
    %c3 = arith.constant 3 : index
    %c0_6 = arith.constant 0 : index
    %c0_7 = arith.constant 0 : index
    %6 = vector.load %arg2[%c3, %c0_6, %c0_7] : memref<9x1x256xf32, #tpu.memory_space<vmem>>, vector<1x1x256xf32>
    %7 = vector.shape_cast %6 : vector<1x1x256xf32> to vector<1x256xf32>
    %c5 = arith.constant 5 : index
    %c0_8 = arith.constant 0 : index
    %c0_9 = arith.constant 0 : index
    %8 = vector.load %arg2[%c5, %c0_8, %c0_9] : memref<9x1x256xf32, #tpu.memory_space<vmem>>, vector<1x1x256xf32>
    %9 = vector.shape_cast %8 : vector<1x1x256xf32> to vector<1x256xf32>
    %c6 = arith.constant 6 : index
    %c0_10 = arith.constant 0 : index
    %c0_11 = arith.constant 0 : index
    %10 = vector.load %arg2[%c6, %c0_10, %c0_11] : memref<9x1x256xf32, #tpu.memory_space<vmem>>, vector<1x1x256xf32>
    %11 = vector.shape_cast %10 : vector<1x1x256xf32> to vector<1x256xf32>
    %c7 = arith.constant 7 : index
    %c0_12 = arith.constant 0 : index
    %c0_13 = arith.constant 0 : index
    %12 = vector.load %arg2[%c7, %c0_12, %c0_13] : memref<9x1x256xf32, #tpu.memory_space<vmem>>, vector<1x1x256xf32>
    %13 = vector.shape_cast %12 : vector<1x1x256xf32> to vector<1x256xf32>
    %c8 = arith.constant 8 : index
    %c0_14 = arith.constant 0 : index
    %c0_15 = arith.constant 0 : index
    %14 = vector.load %arg2[%c8, %c0_14, %c0_15] : memref<9x1x256xf32, #tpu.memory_space<vmem>>, vector<1x1x256xf32>
    %15 = vector.shape_cast %14 : vector<1x1x256xf32> to vector<1x256xf32>
    %c0_16 = arith.constant 0 : index
    %c0_17 = arith.constant 0 : index
    %c0_18 = arith.constant 0 : index
    %16 = vector.load %arg1[%c0_16, %c0_17, %c0_18] : memref<1x64x256xf32, #tpu.memory_space<vmem>>, vector<1x64x256xf32>
    %17 = vector.shape_cast %16 : vector<1x64x256xf32> to vector<64x256xf32>
    %c17_i32 = arith.constant 17 : i32
    %18 = tpu.dynamic_rotate %17 by %c17_i32 dim 1 : vector<64x256xf32>, i32 -> vector<64x256xf32>
    %19 = vector.broadcast %1 : vector<1x256xf32> to vector<64x256xf32>
    %20 = arith.mulf %18, %19 : vector<64x256xf32>
    %c16_i32 = arith.constant 16 : i32
    %21 = tpu.dynamic_rotate %17 by %c16_i32 dim 1 : vector<64x256xf32>, i32 -> vector<64x256xf32>
    %22 = vector.broadcast %3 : vector<1x256xf32> to vector<64x256xf32>
    %23 = arith.mulf %21, %22 : vector<64x256xf32>
    %c15_i32 = arith.constant 15 : i32
    %24 = tpu.dynamic_rotate %17 by %c15_i32 dim 1 : vector<64x256xf32>, i32 -> vector<64x256xf32>
    %25 = vector.broadcast %5 : vector<1x256xf32> to vector<64x256xf32>
    %26 = arith.mulf %24, %25 : vector<64x256xf32>
    %c1_i32 = arith.constant 1 : i32
    %27 = tpu.dynamic_rotate %17 by %c1_i32 dim 1 : vector<64x256xf32>, i32 -> vector<64x256xf32>
    %28 = vector.broadcast %7 : vector<1x256xf32> to vector<64x256xf32>
    %29 = arith.mulf %27, %28 : vector<64x256xf32>
    %c255_i32 = arith.constant 255 : i32
    %30 = tpu.dynamic_rotate %17 by %c255_i32 dim 1 : vector<64x256xf32>, i32 -> vector<64x256xf32>
    %31 = vector.broadcast %9 : vector<1x256xf32> to vector<64x256xf32>
    %32 = arith.mulf %30, %31 : vector<64x256xf32>
    %c241_i32 = arith.constant 241 : i32
    %33 = tpu.dynamic_rotate %17 by %c241_i32 dim 1 : vector<64x256xf32>, i32 -> vector<64x256xf32>
    %34 = vector.broadcast %11 : vector<1x256xf32> to vector<64x256xf32>
    %35 = arith.mulf %33, %34 : vector<64x256xf32>
    %c240_i32 = arith.constant 240 : i32
    %36 = tpu.dynamic_rotate %17 by %c240_i32 dim 1 : vector<64x256xf32>, i32 -> vector<64x256xf32>
    %37 = vector.broadcast %13 : vector<1x256xf32> to vector<64x256xf32>
    %38 = arith.mulf %36, %37 : vector<64x256xf32>
    %c239_i32 = arith.constant 239 : i32
    %39 = tpu.dynamic_rotate %17 by %c239_i32 dim 1 : vector<64x256xf32>, i32 -> vector<64x256xf32>
    %40 = vector.broadcast %15 : vector<1x256xf32> to vector<64x256xf32>
    %41 = arith.mulf %39, %40 : vector<64x256xf32>
    %42 = tpu.concatenate %20, %23, %26, %29, %17, %32, %35, %38, %41 in 0 : vector<64x256xf32>, vector<64x256xf32>, vector<64x256xf32>, vector<64x256xf32>, vector<64x256xf32>, vector<64x256xf32>, vector<64x256xf32>, vector<64x256xf32>, vector<64x256xf32> -> vector<576x256xf32>
    %c0_19 = arith.constant 0 : index
    %c0_20 = arith.constant 0 : index
    %43 = vector.load %arg3[%c0_19, %c0_20] : memref<32x576xf32, #tpu.memory_space<vmem>>, vector<32x576xf32>
    %cst = arith.constant dense<0.000000e+00> : vector<32x256xf32>
    %44 = tpu.matmul %43, %42, %cst {dimension_numbers = #tpu.dot_dimension_numbers<[1], [0], [0], [1], [0, 0, 1, 1], [], []>} : vector<32x576xf32>, vector<576x256xf32>, vector<32x256xf32> -> vector<32x256xf32>
    %c0_21 = arith.constant 0 : index
    %c0_22 = arith.constant 0 : index
    %45 = vector.load %arg4[%c0_21, %c0_22] : memref<32x1xf32, #tpu.memory_space<vmem>>, vector<32x1xf32>
    %46 = vector.broadcast %45 : vector<32x1xf32> to vector<32x256xf32>
    %47 = arith.addf %44, %46 : vector<32x256xf32>
    %cst_23 = arith.constant 0.000000e+00 : f32
    %48 = vector.broadcast %cst_23 : f32 to vector<32x256xf32>
    %49 = arith.maximumf %47, %48 : vector<32x256xf32>
    %c17_i32_24 = arith.constant 17 : i32
    %50 = tpu.dynamic_rotate %49 by %c17_i32_24 dim 1 : vector<32x256xf32>, i32 -> vector<32x256xf32>
    %51 = vector.broadcast %1 : vector<1x256xf32> to vector<32x256xf32>
    %52 = arith.mulf %50, %51 : vector<32x256xf32>
    %c16_i32_25 = arith.constant 16 : i32
    %53 = tpu.dynamic_rotate %49 by %c16_i32_25 dim 1 : vector<32x256xf32>, i32 -> vector<32x256xf32>
    %54 = vector.broadcast %3 : vector<1x256xf32> to vector<32x256xf32>
    %55 = arith.mulf %53, %54 : vector<32x256xf32>
    %c15_i32_26 = arith.constant 15 : i32
    %56 = tpu.dynamic_rotate %49 by %c15_i32_26 dim 1 : vector<32x256xf32>, i32 -> vector<32x256xf32>
    %57 = vector.broadcast %5 : vector<1x256xf32> to vector<32x256xf32>
    %58 = arith.mulf %56, %57 : vector<32x256xf32>
    %c1_i32_27 = arith.constant 1 : i32
    %59 = tpu.dynamic_rotate %49 by %c1_i32_27 dim 1 : vector<32x256xf32>, i32 -> vector<32x256xf32>
    %60 = vector.broadcast %7 : vector<1x256xf32> to vector<32x256xf32>
    %61 = arith.mulf %59, %60 : vector<32x256xf32>
    %c255_i32_28 = arith.constant 255 : i32
    %62 = tpu.dynamic_rotate %49 by %c255_i32_28 dim 1 : vector<32x256xf32>, i32 -> vector<32x256xf32>
    %63 = vector.broadcast %9 : vector<1x256xf32> to vector<32x256xf32>
    %64 = arith.mulf %62, %63 : vector<32x256xf32>
    %c241_i32_29 = arith.constant 241 : i32
    %65 = tpu.dynamic_rotate %49 by %c241_i32_29 dim 1 : vector<32x256xf32>, i32 -> vector<32x256xf32>
    %66 = vector.broadcast %11 : vector<1x256xf32> to vector<32x256xf32>
    %67 = arith.mulf %65, %66 : vector<32x256xf32>
    %c240_i32_30 = arith.constant 240 : i32
    %68 = tpu.dynamic_rotate %49 by %c240_i32_30 dim 1 : vector<32x256xf32>, i32 -> vector<32x256xf32>
    %69 = vector.broadcast %13 : vector<1x256xf32> to vector<32x256xf32>
    %70 = arith.mulf %68, %69 : vector<32x256xf32>
    %c239_i32_31 = arith.constant 239 : i32
    %71 = tpu.dynamic_rotate %49 by %c239_i32_31 dim 1 : vector<32x256xf32>, i32 -> vector<32x256xf32>
    %72 = vector.broadcast %15 : vector<1x256xf32> to vector<32x256xf32>
    %73 = arith.mulf %71, %72 : vector<32x256xf32>
    %74 = tpu.concatenate %52, %55, %58, %61, %49, %64, %67, %70, %73 in 0 : vector<32x256xf32>, vector<32x256xf32>, vector<32x256xf32>, vector<32x256xf32>, vector<32x256xf32>, vector<32x256xf32>, vector<32x256xf32>, vector<32x256xf32>, vector<32x256xf32> -> vector<288x256xf32>
    %c0_32 = arith.constant 0 : index
    %c0_33 = arith.constant 0 : index
    %75 = vector.load %arg5[%c0_32, %c0_33] : memref<16x288xf32, #tpu.memory_space<vmem>>, vector<16x288xf32>
    %cst_34 = arith.constant dense<0.000000e+00> : vector<16x256xf32>
    %76 = tpu.matmul %75, %74, %cst_34 {dimension_numbers = #tpu.dot_dimension_numbers<[1], [0], [0], [1], [0, 0, 1, 1], [], []>} : vector<16x288xf32>, vector<288x256xf32>, vector<16x256xf32> -> vector<16x256xf32>
    %c0_35 = arith.constant 0 : index
    %c0_36 = arith.constant 0 : index
    %77 = vector.load %arg6[%c0_35, %c0_36] : memref<16x1xf32, #tpu.memory_space<vmem>>, vector<16x1xf32>
    %78 = vector.broadcast %77 : vector<16x1xf32> to vector<16x256xf32>
    %79 = arith.addf %76, %78 : vector<16x256xf32>
    %cst_37 = arith.constant 0.000000e+00 : f32
    %80 = vector.broadcast %cst_37 : f32 to vector<16x256xf32>
    %81 = arith.maximumf %79, %80 : vector<16x256xf32>
    %c17_i32_38 = arith.constant 17 : i32
    %82 = tpu.dynamic_rotate %81 by %c17_i32_38 dim 1 : vector<16x256xf32>, i32 -> vector<16x256xf32>
    %83 = vector.broadcast %1 : vector<1x256xf32> to vector<16x256xf32>
    %84 = arith.mulf %82, %83 : vector<16x256xf32>
    %c16_i32_39 = arith.constant 16 : i32
    %85 = tpu.dynamic_rotate %81 by %c16_i32_39 dim 1 : vector<16x256xf32>, i32 -> vector<16x256xf32>
    %86 = vector.broadcast %3 : vector<1x256xf32> to vector<16x256xf32>
    %87 = arith.mulf %85, %86 : vector<16x256xf32>
    %c15_i32_40 = arith.constant 15 : i32
    %88 = tpu.dynamic_rotate %81 by %c15_i32_40 dim 1 : vector<16x256xf32>, i32 -> vector<16x256xf32>
    %89 = vector.broadcast %5 : vector<1x256xf32> to vector<16x256xf32>
    %90 = arith.mulf %88, %89 : vector<16x256xf32>
    %c1_i32_41 = arith.constant 1 : i32
    %91 = tpu.dynamic_rotate %81 by %c1_i32_41 dim 1 : vector<16x256xf32>, i32 -> vector<16x256xf32>
    %92 = vector.broadcast %7 : vector<1x256xf32> to vector<16x256xf32>
    %93 = arith.mulf %91, %92 : vector<16x256xf32>
    %c255_i32_42 = arith.constant 255 : i32
    %94 = tpu.dynamic_rotate %81 by %c255_i32_42 dim 1 : vector<16x256xf32>, i32 -> vector<16x256xf32>
    %95 = vector.broadcast %9 : vector<1x256xf32> to vector<16x256xf32>
    %96 = arith.mulf %94, %95 : vector<16x256xf32>
    %c241_i32_43 = arith.constant 241 : i32
    %97 = tpu.dynamic_rotate %81 by %c241_i32_43 dim 1 : vector<16x256xf32>, i32 -> vector<16x256xf32>
    %98 = vector.broadcast %11 : vector<1x256xf32> to vector<16x256xf32>
    %99 = arith.mulf %97, %98 : vector<16x256xf32>
    %c240_i32_44 = arith.constant 240 : i32
    %100 = tpu.dynamic_rotate %81 by %c240_i32_44 dim 1 : vector<16x256xf32>, i32 -> vector<16x256xf32>
    %101 = vector.broadcast %13 : vector<1x256xf32> to vector<16x256xf32>
    %102 = arith.mulf %100, %101 : vector<16x256xf32>
    %c239_i32_45 = arith.constant 239 : i32
    %103 = tpu.dynamic_rotate %81 by %c239_i32_45 dim 1 : vector<16x256xf32>, i32 -> vector<16x256xf32>
    %104 = vector.broadcast %15 : vector<1x256xf32> to vector<16x256xf32>
    %105 = arith.mulf %103, %104 : vector<16x256xf32>
    %106 = tpu.concatenate %84, %87, %90, %93, %81, %96, %99, %102, %105 in 0 : vector<16x256xf32>, vector<16x256xf32>, vector<16x256xf32>, vector<16x256xf32>, vector<16x256xf32>, vector<16x256xf32>, vector<16x256xf32>, vector<16x256xf32>, vector<16x256xf32> -> vector<144x256xf32>
    %c0_46 = arith.constant 0 : index
    %c0_47 = arith.constant 0 : index
    %107 = vector.load %arg7[%c0_46, %c0_47] : memref<8x144xf32, #tpu.memory_space<vmem>>, vector<8x144xf32>
    %cst_48 = arith.constant dense<0.000000e+00> : vector<8x256xf32>
    %108 = tpu.matmul %107, %106, %cst_48 {dimension_numbers = #tpu.dot_dimension_numbers<[1], [0], [0], [1], [0, 0, 1, 1], [], []>} : vector<8x144xf32>, vector<144x256xf32>, vector<8x256xf32> -> vector<8x256xf32>
    %c0_49 = arith.constant 0 : index
    %c0_50 = arith.constant 0 : index
    %109 = vector.load %arg8[%c0_49, %c0_50] : memref<8x1xf32, #tpu.memory_space<vmem>>, vector<8x1xf32>
    %110 = vector.broadcast %109 : vector<8x1xf32> to vector<8x256xf32>
    %111 = arith.addf %108, %110 : vector<8x256xf32>
    %cst_51 = arith.constant 0.000000e+00 : f32
    %112 = vector.broadcast %cst_51 : f32 to vector<8x256xf32>
    %113 = arith.maximumf %111, %112 : vector<8x256xf32>
    %c17_i32_52 = arith.constant 17 : i32
    %114 = tpu.dynamic_rotate %113 by %c17_i32_52 dim 1 : vector<8x256xf32>, i32 -> vector<8x256xf32>
    %115 = vector.broadcast %1 : vector<1x256xf32> to vector<8x256xf32>
    %116 = arith.mulf %114, %115 : vector<8x256xf32>
    %c16_i32_53 = arith.constant 16 : i32
    %117 = tpu.dynamic_rotate %113 by %c16_i32_53 dim 1 : vector<8x256xf32>, i32 -> vector<8x256xf32>
    %118 = vector.broadcast %3 : vector<1x256xf32> to vector<8x256xf32>
    %119 = arith.mulf %117, %118 : vector<8x256xf32>
    %c15_i32_54 = arith.constant 15 : i32
    %120 = tpu.dynamic_rotate %113 by %c15_i32_54 dim 1 : vector<8x256xf32>, i32 -> vector<8x256xf32>
    %121 = vector.broadcast %5 : vector<1x256xf32> to vector<8x256xf32>
    %122 = arith.mulf %120, %121 : vector<8x256xf32>
    %c1_i32_55 = arith.constant 1 : i32
    %123 = tpu.dynamic_rotate %113 by %c1_i32_55 dim 1 : vector<8x256xf32>, i32 -> vector<8x256xf32>
    %124 = vector.broadcast %7 : vector<1x256xf32> to vector<8x256xf32>
    %125 = arith.mulf %123, %124 : vector<8x256xf32>
    %c255_i32_56 = arith.constant 255 : i32
    %126 = tpu.dynamic_rotate %113 by %c255_i32_56 dim 1 : vector<8x256xf32>, i32 -> vector<8x256xf32>
    %127 = vector.broadcast %9 : vector<1x256xf32> to vector<8x256xf32>
    %128 = arith.mulf %126, %127 : vector<8x256xf32>
    %c241_i32_57 = arith.constant 241 : i32
    %129 = tpu.dynamic_rotate %113 by %c241_i32_57 dim 1 : vector<8x256xf32>, i32 -> vector<8x256xf32>
    %130 = vector.broadcast %11 : vector<1x256xf32> to vector<8x256xf32>
    %131 = arith.mulf %129, %130 : vector<8x256xf32>
    %c240_i32_58 = arith.constant 240 : i32
    %132 = tpu.dynamic_rotate %113 by %c240_i32_58 dim 1 : vector<8x256xf32>, i32 -> vector<8x256xf32>
    %133 = vector.broadcast %13 : vector<1x256xf32> to vector<8x256xf32>
    %134 = arith.mulf %132, %133 : vector<8x256xf32>
    %c239_i32_59 = arith.constant 239 : i32
    %135 = tpu.dynamic_rotate %113 by %c239_i32_59 dim 1 : vector<8x256xf32>, i32 -> vector<8x256xf32>
    %136 = vector.broadcast %15 : vector<1x256xf32> to vector<8x256xf32>
    %137 = arith.mulf %135, %136 : vector<8x256xf32>
    %138 = tpu.concatenate %116, %119, %122, %125, %113, %128, %131, %134, %137 in 0 : vector<8x256xf32>, vector<8x256xf32>, vector<8x256xf32>, vector<8x256xf32>, vector<8x256xf32>, vector<8x256xf32>, vector<8x256xf32>, vector<8x256xf32>, vector<8x256xf32> -> vector<72x256xf32>
    %c0_60 = arith.constant 0 : index
    %c0_61 = arith.constant 0 : index
    %139 = vector.load %arg9[%c0_60, %c0_61] : memref<3x72xf32, #tpu.memory_space<vmem>>, vector<3x72xf32>
    %cst_62 = arith.constant dense<0.000000e+00> : vector<3x256xf32>
    %140 = tpu.matmul %139, %138, %cst_62 {dimension_numbers = #tpu.dot_dimension_numbers<[1], [0], [0], [1], [0, 0, 1, 1], [], []>} : vector<3x72xf32>, vector<72x256xf32>, vector<3x256xf32> -> vector<3x256xf32>
    %c0_63 = arith.constant 0 : index
    %c0_64 = arith.constant 0 : index
    %141 = vector.load %arg10[%c0_63, %c0_64] : memref<3x1xf32, #tpu.memory_space<vmem>>, vector<3x1xf32>
    %142 = vector.broadcast %141 : vector<3x1xf32> to vector<3x256xf32>
    %143 = arith.addf %140, %142 : vector<3x256xf32>
    %c0_65 = arith.constant 0 : index
    %c0_66 = arith.constant 0 : index
    %c0_67 = arith.constant 0 : index
    %144 = vector.load %arg11[%c0_65, %c0_66, %c0_67] : memref<1x3x256xf32, #tpu.memory_space<vmem>>, vector<1x3x256xf32>
    %145 = vector.shape_cast %144 : vector<1x3x256xf32> to vector<3x256xf32>
    %146 = vector.shape_cast %143 : vector<3x256xf32> to vector<1x3x256xf32>
    tpu.vector_store %arg11[%c0_65, %c0_66, %c0_67], %146 {strides = array<i32>} : memref<1x3x256xf32, #tpu.memory_space<vmem>>, vector<1x3x256xf32>,
    return
  }
  func.func @transform_0(%arg0: i32) -> (i32, i32, i32) {
    %c0_i32 = arith.constant 0 : i32
    %c0_i32_0 = arith.constant 0 : i32
    %c0_i32_1 = arith.constant 0 : i32
    return %arg0, %c0_i32, %c0_i32_0 : i32, i32, i32
  }
  func.func @transform_1(%arg0: i32) -> (i32, i32, i32) {
    %c0_i32 = arith.constant 0 : i32
    %c0_i32_0 = arith.constant 0 : i32
    %c0_i32_1 = arith.constant 0 : i32
    %c0_i32_2 = arith.constant 0 : i32
    return %c0_i32, %c0_i32_0, %c0_i32_1 : i32, i32, i32
  }
  func.func @transform_2(%arg0: i32) -> (i32, i32) {
    %c0_i32 = arith.constant 0 : i32
    %c0_i32_0 = arith.constant 0 : i32
    %c0_i32_1 = arith.constant 0 : i32
    return %c0_i32, %c0_i32_0 : i32, i32
  }
  func.func @transform_3(%arg0: i32) -> (i32, i32) {
    %c0_i32 = arith.constant 0 : i32
    %c0_i32_0 = arith.constant 0 : i32
    %c0_i32_1 = arith.constant 0 : i32
    return %c0_i32, %c0_i32_0 : i32, i32
  }
  func.func @transform_4(%arg0: i32) -> (i32, i32) {
    %c0_i32 = arith.constant 0 : i32
    %c0_i32_0 = arith.constant 0 : i32
    %c0_i32_1 = arith.constant 0 : i32
    return %c0_i32, %c0_i32_0 : i32, i32
  }
  func.func @transform_5(%arg0: i32) -> (i32, i32) {
    %c0_i32 = arith.constant 0 : i32
    %c0_i32_0 = arith.constant 0 : i32
    %c0_i32_1 = arith.constant 0 : i32
    return %c0_i32, %c0_i32_0 : i32, i32
  }
  func.func @transform_6(%arg0: i32) -> (i32, i32) {
    %c0_i32 = arith.constant 0 : i32
    %c0_i32_0 = arith.constant 0 : i32
    %c0_i32_1 = arith.constant 0 : i32
    return %c0_i32, %c0_i32_0 : i32, i32
  }
  func.func @transform_7(%arg0: i32) -> (i32, i32) {
    %c0_i32 = arith.constant 0 : i32
    %c0_i32_0 = arith.constant 0 : i32
    %c0_i32_1 = arith.constant 0 : i32
    return %c0_i32, %c0_i32_0 : i32, i32
  }
  func.func @transform_8(%arg0: i32) -> (i32, i32) {
    %c0_i32 = arith.constant 0 : i32
    %c0_i32_0 = arith.constant 0 : i32
    %c0_i32_1 = arith.constant 0 : i32
    return %c0_i32, %c0_i32_0 : i32, i32
  }
  func.func @transform_9(%arg0: i32) -> (i32, i32) {
    %c0_i32 = arith.constant 0 : i32
    %c0_i32_0 = arith.constant 0 : i32
    %c0_i32_1 = arith.constant 0 : i32
    return %c0_i32, %c0_i32_0 : i32, i32
  }
  func.func @transform_10(%arg0: i32) -> (i32, i32, i32) {
    %c0_i32 = arith.constant 0 : i32
    %c0_i32_0 = arith.constant 0 : i32
    %c0_i32_1 = arith.constant 0 : i32
    return %arg0, %c0_i32, %c0_i32_0 : i32, i32, i32
  }
}

</mosaic_0001>

<bundles_post_ra>
// kernel: simplenet_forward.1
= control target key start
LH: loop header
LB: loop body
LE: loop exit
PB: predicated region body
PF: predicated region fallthrough
CT: control target
= control target key end

     0   :  { %s2612_s13 = smov 0   ;;  %s4268_s0 = inlined_call_operand.vmem [shape: f32[2,64,256], index: 0, kind: input, shape index: {}]   ;;  %s4269_s1 = inlined_call_operand.vmem [shape: f32[9,1,256], index: 1, kind: input, shape index: {}]   ;;  %s4270_s2 = inlined_call_operand.vmem [shape: f32[32,576], index: 2, kind: input, shape index: {}]   ;;  %s4271_s3 = inlined_call_operand.vmem [shape: f32[32,1], index: 3, kind: input, shape index: {}]   ;;  %s4272_s4 = inlined_call_operand.vmem [shape: f32[16,288], index: 4, kind: input, shape index: {}]   ;;  %s4273_s5 = inlined_call_operand.vmem [shape: f32[16,1], index: 5, kind: input, shape index: {}]   ;;  %s4274_s6 = inlined_call_operand.vmem [shape: f32[8,144], index: 6, kind: input, shape index: {}]   ;;  %s4275_s7 = inlined_call_operand.vmem [shape: f32[8,1], index: 7, kind: input, shape index: {}]   ;;  %s4276_s8 = inlined_call_operand.vmem [shape: f32[3,72], index: 8, kind: input, shape index: {}]   ;;  %s4277_s9 = inlined_call_operand.vmem [shape: f32[3,1], index: 9, kind: input, shape index: {}]   ;;  %s4278_s10 = inlined_call_operand.vmem [shape: f32[2,3,256], index: 10, kind: output, shape index: {}]  }
   0x1 LB: > { %s2191_s14 = sadd.s32 4294967295, %s2545_s13   ;;  %p2195_p0 = scmp.ge.s32.totalorder %s2545_s13, 1  ;;  %s2545_s13 = sphi %s2612_s13, %s20_s13  }
   0x2   : > { %p312_p1 = scmp.lt.s32.totalorder %s2545_s13, 3 }
   0x4   : > { %p313_p2 = pnand %p2195_p0, %p312_p1 }
   0x6   : > { %316 = sbr.rel (%p313_p2) target bundleno = 1853 (0x73d), region = 60 }
   0xd   : > { %p350_p3 = scmp.lt.s32.totalorder %s2191_s14, 1  ;;  %s2547_s19 = smov 17   ;;  %v423_v16 = vlaneseq  ;;  %v360_v20 = vld [vmem:[%s4269_s1] sm:$0x3]  ;;  %v1002_v36 = vld [vmem:[%s4270_s2 + $0x8] sm:$0xff]  ;;  %vm1045_vm8 = vcmask 523264  }
   0xe   : > { %s2548_s20 = smov 16   ;;  %s2549_s21 = smov 15   ;;  %1122 = vmatprep.mubr.f32.mxu0 %v1002_v36  ;;  %v2200_v36 = vld [vmem:[%s4269_s1 + $0x2] sm:$0x3]  ;;  %vm1607_vm9 = vcmask 261120   ;;  %vm1908_vm10 = vcmask 130048  }
   0xf   : > { %s4295_s14 = smov (!%p350_p3, %s2191_s14), 1  ;;  %s2550_s22 = smov 1   ;;  %v444_v17 = vshrl.u32 %v423_v16, 7  ;;  %v2788_v18 = vand.u32 127, %v423_v16  ;;  %vm2056_vm11 = vcmask 588800  }
  0x10   : > { %s2217_s15 = sshll.u32 %s4295_s14, 7  ;;  %s2551_s27 = smov 127  }
  0x11   : > { %s2626_s18 = scalar_lea.vmem %s4268_s0, %s2217_s15  ;;  %v2790_v19 = vsub.s32 1, %v444_v17  ;;  %v2799_v21 = vsub.s32 0, %v444_v17  ;;  %vm425_vm0 = vcmp.lt.s32.totalorder %v2788_v18, 17  ;;  %vm501_vm1 = vcmp.lt.s32.totalorder %v2788_v18, 16  ;;  %s2552_s30 = smov 113  }
  0x12   : > { %v2629_v0 = vld [vmem:[%s2626_s18 + $0x8] sm:$0xff]  ;;  %v2632_v1 = vld [vmem:[%s2626_s18] sm:$0xff]  ;;  %v2639_v2 = vld [vmem:[%s2626_s18 + $0x18] sm:$0xff]  ;;  %vm577_vm2 = vcmp.lt.s32.totalorder %v2788_v18, 15  ;;  %s2553_s15 = smov 112   ;;  %s2554_s16 = smov 111  }
  0x13   : > { %407 = vrot.lane.b32.xlu1 %v2629_v0, %s2547_s19  ;;  %391 = vrot.lane.b32.xlu0 %v2632_v1, %s2547_s19  ;;  %v2642_v3 = vld [vmem:[%s2626_s18 + $0x10] sm:$0xff]  ;;  %v2652_v5 = vld [vmem:[%s2626_s18 + $0x20] sm:$0xff]  ;;  %v2803_v24 = vrot.slane %v360_v20, %v2790_v19  ;;  %v2812_v26 = vrot.slane %v360_v20, %v2799_v21  ;;  %vm653_vm3 = vcmp.lt.s32.totalorder %v2788_v18, 1  ;;  %vm729_vm4 = vcmp.lt.s32.totalorder %v2788_v18, 127 }
  0x14   : > { %v2649_v4 = vld [vmem:[%s2626_s18 + $0x30] sm:$0xff]  ;;  %v2659_v6 = vld [vmem:[%s2626_s18 + $0x38] sm:$0xff]  ;;  %v2662_v7 = vld [vmem:[%s2626_s18 + $0x28] sm:$0xff]  ;;  %vm805_vm5 = vcmp.lt.s32.totalorder %v2788_v18, 113  ;;  %vm881_vm6 = vcmp.lt.s32.totalorder %v2788_v18, 112  ;;  %vm957_vm7 = vcmp.lt.s32.totalorder %v2788_v18, 111 }
  0x15   : > { %v2669_v8 = vld [vmem:[%s2626_s18 + $0x50] sm:$0xff]  ;;  %v2672_v9 = vld [vmem:[%s2626_s18 + $0x40] sm:$0xff]  ;;  %v2679_v10 = vld [vmem:[%s2626_s18 + $0x58] sm:$0xff] }
  0x16   : > { %v2682_v11 = vld [vmem:[%s2626_s18 + $0x48] sm:$0xff]  ;;  %v2689_v12 = vld [vmem:[%s2626_s18 + $0x70] sm:$0xff]  ;;  %v2692_v13 = vld [vmem:[%s2626_s18 + $0x60] sm:$0xff] }
  0x17   : > { %409 = vrot.lane.b32.xlu1 %v2639_v2, %s2547_s19  ;;  %393 = vrot.lane.b32.xlu0 %v2642_v3, %s2547_s19  ;;  %v2699_v14 = vld [vmem:[%s2626_s18 + $0x78] sm:$0xff]  ;;  %v2702_v15 = vld [vmem:[%s2626_s18 + $0x68] sm:$0xff] }
  0x1b   : > { %397 = vrot.lane.b32.xlu1 %v2649_v4, %s2547_s19  ;;  %395 = vrot.lane.b32.xlu0 %v2652_v5, %s2547_s19 }
  0x1f   : > { %413 = vrot.lane.b32.xlu1 %v2659_v6, %s2547_s19  ;;  %411 = vrot.lane.b32.xlu0 %v2662_v7, %s2547_s19 }
  0x23   : > { %401 = vrot.lane.b32.xlu1 %v2669_v8, %s2547_s19  ;;  %399 = vrot.lane.b32.xlu0 %v2672_v9, %s2547_s19 }
  0x27   : > { %417 = vrot.lane.b32.xlu1 %v2679_v10, %s2547_s19  ;;  %415 = vrot.lane.b32.xlu0 %v2682_v11, %s2547_s19 }
  0x2b   : > { %405 = vrot.lane.b32.xlu1 %v2689_v12, %s2547_s19  ;;  %403 = vrot.lane.b32.xlu0 %v2692_v13, %s2547_s19 }
  0x2f   : > { %421 = vrot.lane.b32.xlu1 %v2699_v14, %s2547_s19  ;;  %419 = vrot.lane.b32.xlu0 %v2702_v15, %s2547_s19 }
  0x33   : > { %471 = vrot.lane.b32.xlu1 %v2642_v3, %s2548_s20  ;;  %469 = vrot.lane.b32.xlu0 %v2632_v1, %s2548_s20 }
  0x37   : > { %487 = vrot.lane.b32.xlu1 %v2639_v2, %s2548_s20  ;;  %485 = vrot.lane.b32.xlu0 %v2629_v0, %s2548_s20 }
  0x3b   : > { %475 = vrot.lane.b32.xlu1 %v2649_v4, %s2548_s20  ;;  %473 = vrot.lane.b32.xlu0 %v2652_v5, %s2548_s20 }
  0x3f   : > { %491 = vrot.lane.b32.xlu1 %v2659_v6, %s2548_s20  ;;  %489 = vrot.lane.b32.xlu0 %v2662_v7, %s2548_s20 }
  0x43   : > { %479 = vrot.lane.b32.xlu1 %v2669_v8, %s2548_s20  ;;  %477 = vrot.lane.b32.xlu0 %v2672_v9, %s2548_s20 }
  0x47   : > { %495 = vrot.lane.b32.xlu1 %v2679_v10, %s2548_s20  ;;  %493 = vrot.lane.b32.xlu0 %v2682_v11, %s2548_s20 }
  0x4b   : > { %483 = vrot.lane.b32.xlu1 %v2689_v12, %s2548_s20  ;;  %481 = vrot.lane.b32.xlu0 %v2692_v13, %s2548_s20 }
  0x4f   : > { %499 = vrot.lane.b32.xlu1 %v2699_v14, %s2548_s20  ;;  %497 = vrot.lane.b32.xlu0 %v2702_v15, %s2548_s20 }
  0x53   : > { %547 = vrot.lane.b32.xlu1 %v2642_v3, %s2549_s21  ;;  %545 = vrot.lane.b32.xlu0 %v2632_v1, %s2549_s21 }
  0x57   : > { %563 = vrot.lane.b32.xlu1 %v2639_v2, %s2549_s21  ;;  %561 = vrot.lane.b32.xlu0 %v2629_v0, %s2549_s21 }
  0x5b   : > { %551 = vrot.lane.b32.xlu1 %v2649_v4, %s2549_s21  ;;  %549 = vrot.lane.b32.xlu0 %v2652_v5, %s2549_s21 }
  0x5f   : > { %567 = vrot.lane.b32.xlu1 %v2659_v6, %s2549_s21  ;;  %565 = vrot.lane.b32.xlu0 %v2662_v7, %s2549_s21 }
  0x63   : > { %555 = vrot.lane.b32.xlu1 %v2669_v8, %s2549_s21  ;;  %553 = vrot.lane.b32.xlu0 %v2672_v9, %s2549_s21 }
  0x67   : > { %571 = vrot.lane.b32.xlu1 %v2679_v10, %s2549_s21  ;;  %569 = vrot.lane.b32.xlu0 %v2682_v11, %s2549_s21 }
  0x6b   : > { %559 = vrot.lane.b32.xlu1 %v2689_v12, %s2549_s21  ;;  %557 = vrot.lane.b32.xlu0 %v2692_v13, %s2549_s21 }
  0x6f   : > { %575 = vrot.lane.b32.xlu1 %v2699_v14, %s2549_s21  ;;  %573 = vrot.lane.b32.xlu0 %v2702_v15, %s2549_s21 }
  0x73   : > { %623 = vrot.lane.b32.xlu1 %v2642_v3, %s2550_s22  ;;  %621 = vrot.lane.b32.xlu0 %v2632_v1, %s2550_s22 }
  0x77   : > { %639 = vrot.lane.b32.xlu1 %v2639_v2, %s2550_s22  ;;  %637 = vrot.lane.b32.xlu0 %v2629_v0, %s2550_s22 }
  0x7b   : > { %627 = vrot.lane.b32.xlu1 %v2649_v4, %s2550_s22  ;;  %625 = vrot.lane.b32.xlu0 %v2652_v5, %s2550_s22 }
  0x7f   : > { %643 = vrot.lane.b32.xlu1 %v2659_v6, %s2550_s22  ;;  %641 = vrot.lane.b32.xlu0 %v2662_v7, %s2550_s22 }
  0x83   : > { %631 = vrot.lane.b32.xlu1 %v2669_v8, %s2550_s22  ;;  %629 = vrot.lane.b32.xlu0 %v2672_v9, %s2550_s22 }
  0x85   : > { %v408_v22 = vpop.permute.xlu1 %407  ;;  %v392_v23 = vpop.permute.xlu0 %391 }
  0x86   : > { %v426_v25 = vsel %vm425_vm0, %v392_v23, %v408_v22  ;;  %v434_v27 = vsel %vm425_vm0, %v408_v22, %v392_v23 }
  0x87   : > { %647 = vrot.lane.b32.xlu1 %v2679_v10, %s2550_s22  ;;  %645 = vrot.lane.b32.xlu0 %v2682_v11, %s2550_s22  ;;  %v454_v32 = vmul.f32 %v2803_v24, %v426_v25  ;;  %v453_v34 = vmul.f32 %v2812_v26, %v434_v27 }
  0x89   : > { %v410_v28 = vpop.permute.xlu1 %409  ;;  %v394_v29 = vpop.permute.xlu0 %393 }
  0x8a   : > { %v435_v30 = vsel %vm425_vm0, %v410_v28, %v394_v29  ;;  %v427_v31 = vsel %vm425_vm0, %v394_v29, %v410_v28 }
  0x8b   : > { %635 = vrot.lane.b32.xlu1 %v2689_v12, %s2550_s22  ;;  %633 = vrot.lane.b32.xlu0 %v2692_v13, %s2550_s22  ;;  %v456_v33 = vmul.f32 %v2803_v24, %v427_v31  ;;  %v455_v35 = vmul.f32 %v2812_v26, %v435_v30 }
  0x8d   : > { %v398_v37 = vpop.permute.xlu1 %397  ;;  %v396_v38 = vpop.permute.xlu0 %395  ;;  %v2219_v39 = vpack.c.bf16 %v456_v33, %v454_v32  ;;  %v2221_v40 = vpack.c.bf16 %v455_v35, %v453_v34 }
  0x8f   : > { %651 = vrot.lane.b32.xlu1 %v2699_v14, %s2550_s22  ;;  %649 = vrot.lane.b32.xlu0 %v2702_v15, %s2550_s22 }
  0x90   : > { %2220 = vmatprep.subr.bf16.mxu0 %v2219_v39 }
  0x91   : > { %2222 = vmatpush1.bf16.msra.mxu0 %v2221_v40  ;;  %v414_v41 = vpop.permute.xlu1 %413  ;;  %v412_v42 = vpop.permute.xlu0 %411 }
  0x92   : > { %v429_v43 = vsel %vm425_vm0, %v398_v37, %v414_v41  ;;  %v437_v44 = vsel %vm425_vm0, %v414_v41, %v398_v37  ;;  %v428_v45 = vsel %vm425_vm0, %v396_v38, %v412_v42  ;;  %v436_v46 = vsel %vm425_vm0, %v412_v42, %v396_v38 }
  0x93   : > { %v459_v47 = vmul.f32 %v2812_v26, %v437_v44  ;;  %v460_v48 = vmul.f32 %v2803_v24, %v429_v43  ;;  %v457_v49 = vmul.f32 %v2812_v26, %v436_v46  ;;  %v458_v50 = vmul.f32 %v2803_v24, %v428_v45  ;;  %699 = vrot.lane.b32.xlu1 %v2642_v3, %s2551_s27 }
  0x94   : > { %697 = vrot.lane.b32.xlu0 %v2632_v1, %s2551_s27  ;;  %v2898_v41 = vrot.slane %v2200_v36, %v2799_v21  ;;  %v2901_v42 = vrot.slane %v2200_v36, %v2790_v19 }
  0x95   : > { %v402_v51 = vpop.permute.xlu1 %401  ;;  %v400_v52 = vpop.permute.xlu0 %399  ;;  %v2223_v53 = vpack.c.bf16 %v460_v48, %v458_v50  ;;  %v2225_v54 = vpack.c.bf16 %v459_v47, %v457_v49 }
  0x97   : > { %715 = vrot.lane.b32.xlu1 %v2639_v2, %s2551_s27  ;;  %2224 = vmatprep.subr.bf16.mxu0 %v2223_v53 }
  0x98   : > { %713 = vrot.lane.b32.xlu0 %v2629_v0, %s2551_s27  ;;  %2226 = vmatpush1.bf16.msra.mxu0 %v2225_v54 }
  0x99   : > { %v418_v55 = vpop.permute.xlu1 %417  ;;  %v416_v56 = vpop.permute.xlu0 %415 }
  0x9a   : > { %v431_v57 = vsel %vm425_vm0, %v402_v51, %v418_v55  ;;  %v439_v58 = vsel %vm425_vm0, %v418_v55, %v402_v51  ;;  %v430_v59 = vsel %vm425_vm0, %v400_v52, %v416_v56  ;;  %v438_v60 = vsel %vm425_vm0, %v416_v56, %v400_v52 }
  0x9b   : > { %v463_v61 = vmul.f32 %v2812_v26, %v439_v58  ;;  %v464_v62 = vmul.f32 %v2803_v24, %v431_v57  ;;  %v461_v63 = vmul.f32 %v2812_v26, %v438_v60  ;;  %v462_v16 = vmul.f32 %v2803_v24, %v430_v59  ;;  %703 = vrot.lane.b32.xlu1 %v2649_v4, %s2551_s27 }
  0x9c   : > { %701 = vrot.lane.b32.xlu0 %v2652_v5, %s2551_s27 }
  0x9d   : > { %v406_v17 = vpop.permute.xlu1 %405  ;;  %v404_v20 = vpop.permute.xlu0 %403  ;;  %v2227_v22 = vpack.c.bf16 %v464_v62, %v462_v16  ;;  %v2229_v23 = vpack.c.bf16 %v463_v61, %v461_v63 }
  0x9f   : > { %719 = vrot.lane.b32.xlu1 %v2659_v6, %s2551_s27  ;;  %2228 = vmatprep.subr.bf16.mxu0 %v2227_v22 }
  0xa0   : > { %717 = vrot.lane.b32.xlu0 %v2662_v7, %s2551_s27  ;;  %2230 = vmatpush1.bf16.msra.mxu0 %v2229_v23 }
  0xa1   : > { %v422_v25 = vpop.permute.xlu1 %421  ;;  %v420_v27 = vpop.permute.xlu0 %419 }
  0xa2   : > { %v433_v28 = vsel %vm425_vm0, %v406_v17, %v422_v25  ;;  %v441_v29 = vsel %vm425_vm0, %v422_v25, %v406_v17  ;;  %v432_v30 = vsel %vm425_vm0, %v404_v20, %v420_v27  ;;  %v440_v31 = vsel %vm425_vm0, %v420_v27, %v404_v20 }
  0xa3   : > { %v467_v32 = vmul.f32 %v2812_v26, %v441_v29  ;;  %v468_v33 = vmul.f32 %v2803_v24, %v433_v28  ;;  %v465_v34 = vmul.f32 %v2812_v26, %v440_v31  ;;  %v466_v35 = vmul.f32 %v2803_v24, %v432_v30  ;;  %707 = vrot.lane.b32.xlu1 %v2669_v8, %s2551_s27 }
  0xa4   : > { %705 = vrot.lane.b32.xlu0 %v2672_v9, %s2551_s27 }
  0xa5   : > { %v472_v37 = vpop.permute.xlu1 %471  ;;  %v470_v38 = vpop.permute.xlu0 %469  ;;  %v2231_v39 = vpack.c.bf16 %v468_v33, %v466_v35  ;;  %v2233_v40 = vpack.c.bf16 %v467_v32, %v465_v34 }
  0xa7   : > { %723 = vrot.lane.b32.xlu1 %v2679_v10, %s2551_s27  ;;  %2232 = vmatprep.subr.bf16.mxu0 %v2231_v39 }
  0xa8   : > { %721 = vrot.lane.b32.xlu0 %v2682_v11, %s2551_s27  ;;  %2234 = vmatpush1.bf16.msra.mxu0 %v2233_v40 }
  0xa9   : > { %v488_v43 = vpop.permute.xlu1 %487  ;;  %v486_v44 = vpop.permute.xlu0 %485 }
  0xaa   : > { %v503_v45 = vsel %vm501_vm1, %v472_v37, %v488_v43  ;;  %v511_v46 = vsel %vm501_vm1, %v488_v43, %v472_v37  ;;  %v502_v47 = vsel %vm501_vm1, %v470_v38, %v486_v44  ;;  %v510_v48 = vsel %vm501_vm1, %v486_v44, %v470_v38 }
  0xab   : > { %v531_v49 = vmul.f32 %v2898_v41, %v511_v46  ;;  %v532_v50 = vmul.f32 %v2901_v42, %v503_v45  ;;  %v529_v51 = vmul.f32 %v2898_v41, %v510_v48  ;;  %v530_v52 = vmul.f32 %v2901_v42, %v502_v47  ;;  %711 = vrot.lane.b32.xlu1 %v2689_v12, %s2551_s27 }
  0xac   : > { %709 = vrot.lane.b32.xlu0 %v2692_v13, %s2551_s27 }
  0xad   : > { %v476_v53 = vpop.permute.xlu1 %475  ;;  %v474_v54 = vpop.permute.xlu0 %473  ;;  %v2235_v55 = vpack.c.bf16 %v532_v50, %v530_v52  ;;  %v2237_v56 = vpack.c.bf16 %v531_v49, %v529_v51 }
  0xaf   : > { %727 = vrot.lane.b32.xlu1 %v2699_v14, %s2551_s27  ;;  %2236 = vmatprep.subr.bf16.mxu0 %v2235_v55 }
  0xb0   : > { %725 = vrot.lane.b32.xlu0 %v2702_v15, %s2551_s27  ;;  %2238 = vmatpush1.bf16.msra.mxu0 %v2237_v56 }
  0xb1   : > { %v492_v57 = vpop.permute.xlu1 %491  ;;  %v490_v58 = vpop.permute.xlu0 %489 }
  0xb2   : > { %v505_v59 = vsel %vm501_vm1, %v476_v53, %v492_v57  ;;  %v513_v60 = vsel %vm501_vm1, %v492_v57, %v476_v53  ;;  %v504_v61 = vsel %vm501_vm1, %v474_v54, %v490_v58  ;;  %v512_v62 = vsel %vm501_vm1, %v490_v58, %v474_v54  ;;  %v2201_v54 = vld [vmem:[%s4269_s1 + $0x4] sm:$0x3] }
  0xb3   : > { %v535_v63 = vmul.f32 %v2898_v41, %v513_v60  ;;  %v536_v16 = vmul.f32 %v2901_v42, %v505_v59  ;;  %v533_v17 = vmul.f32 %v2898_v41, %v512_v62  ;;  %v534_v20 = vmul.f32 %v2901_v42, %v504_v61  ;;  %775 = vrot.lane.b32.xlu1 %v2642_v3, %s2552_s30 }
  0xb4   : > { %773 = vrot.lane.b32.xlu0 %v2632_v1, %s2552_s30  ;;  %v2988_v59 = vrot.slane %v2201_v54, %v2799_v21  ;;  %v2991_v60 = vrot.slane %v2201_v54, %v2790_v19 }
  0xb5   : > { %v480_v22 = vpop.permute.xlu1 %479  ;;  %v478_v23 = vpop.permute.xlu0 %477  ;;  %v2239_v25 = vpack.c.bf16 %v536_v16, %v534_v20  ;;  %v2241_v27 = vpack.c.bf16 %v535_v63, %v533_v17 }
  0xb7   : > { %791 = vrot.lane.b32.xlu1 %v2639_v2, %s2552_s30  ;;  %2240 = vmatprep.subr.bf16.mxu0 %v2239_v25 }
  0xb8   : > { %789 = vrot.lane.b32.xlu0 %v2629_v0, %s2552_s30  ;;  %2242 = vmatpush1.bf16.msra.mxu0 %v2241_v27 }
  0xb9   : > { %v496_v28 = vpop.permute.xlu1 %495  ;;  %v494_v29 = vpop.permute.xlu0 %493 }
  0xba   : > { %v507_v30 = vsel %vm501_vm1, %v480_v22, %v496_v28  ;;  %v515_v31 = vsel %vm501_vm1, %v496_v28, %v480_v22  ;;  %v506_v32 = vsel %vm501_vm1, %v478_v23, %v494_v29  ;;  %v514_v33 = vsel %vm501_vm1, %v494_v29, %v478_v23 }
  0xbb   : > { %v539_v34 = vmul.f32 %v2898_v41, %v515_v31  ;;  %v540_v35 = vmul.f32 %v2901_v42, %v507_v30  ;;  %v537_v36 = vmul.f32 %v2898_v41, %v514_v33  ;;  %v538_v37 = vmul.f32 %v2901_v42, %v506_v32  ;;  %779 = vrot.lane.b32.xlu1 %v2649_v4, %s2552_s30 }
  0xbc   : > { %777 = vrot.lane.b32.xlu0 %v2652_v5, %s2552_s30 }
  0xbd   : > { %v484_v38 = vpop.permute.xlu1 %483  ;;  %v482_v39 = vpop.permute.xlu0 %481  ;;  %v2243_v40 = vpack.c.bf16 %v540_v35, %v538_v37  ;;  %v2245_v43 = vpack.c.bf16 %v539_v34, %v537_v36 }
  0xbf   : > { %795 = vrot.lane.b32.xlu1 %v2659_v6, %s2552_s30  ;;  %2244 = vmatprep.subr.bf16.mxu0 %v2243_v40 }
  0xc0   : > { %793 = vrot.lane.b32.xlu0 %v2662_v7, %s2552_s30  ;;  %2246 = vmatpush1.bf16.msra.mxu0 %v2245_v43 }
  0xc1   : > { %v500_v44 = vpop.permute.xlu1 %499  ;;  %v498_v45 = vpop.permute.xlu0 %497 }
  0xc2   : > { %v509_v46 = vsel %vm501_vm1, %v484_v38, %v500_v44  ;;  %v517_v47 = vsel %vm501_vm1, %v500_v44, %v484_v38  ;;  %v508_v48 = vsel %vm501_vm1, %v482_v39, %v498_v45  ;;  %v516_v49 = vsel %vm501_vm1, %v498_v45, %v482_v39 }
  0xc3   : > { %v543_v50 = vmul.f32 %v2898_v41, %v517_v47  ;;  %v544_v51 = vmul.f32 %v2901_v42, %v509_v46  ;;  %v541_v52 = vmul.f32 %v2898_v41, %v516_v49  ;;  %v542_v53 = vmul.f32 %v2901_v42, %v508_v48  ;;  %783 = vrot.lane.b32.xlu1 %v2669_v8, %s2552_s30 }
  0xc4   : > { %781 = vrot.lane.b32.xlu0 %v2672_v9, %s2552_s30 }
  0xc5   : > { %v548_v55 = vpop.permute.xlu1 %547  ;;  %v546_v56 = vpop.permute.xlu0 %545  ;;  %v2247_v57 = vpack.c.bf16 %v544_v51, %v542_v53  ;;  %v2249_v58 = vpack.c.bf16 %v543_v50, %v541_v52 }
  0xc7   : > { %799 = vrot.lane.b32.xlu1 %v2679_v10, %s2552_s30  ;;  %2248 = vmatprep.subr.bf16.mxu0 %v2247_v57 }
  0xc8   : > { %797 = vrot.lane.b32.xlu0 %v2682_v11, %s2552_s30  ;;  %2250 = vmatpush1.bf16.msra.mxu0 %v2249_v58 }
  0xc9   : > { %v564_v61 = vpop.permute.xlu1 %563  ;;  %v562_v62 = vpop.permute.xlu0 %561 }
  0xca   : > { %v579_v63 = vsel %vm577_vm2, %v548_v55, %v564_v61  ;;  %v587_v16 = vsel %vm577_vm2, %v564_v61, %v548_v55  ;;  %v578_v17 = vsel %vm577_vm2, %v546_v56, %v562_v62  ;;  %v586_v20 = vsel %vm577_vm2, %v562_v62, %v546_v56 }
  0xcb   : > { %v607_v22 = vmul.f32 %v2988_v59, %v587_v16  ;;  %v608_v23 = vmul.f32 %v2991_v60, %v579_v63  ;;  %v605_v25 = vmul.f32 %v2988_v59, %v586_v20  ;;  %v606_v27 = vmul.f32 %v2991_v60, %v578_v17  ;;  %787 = vrot.lane.b32.xlu1 %v2689_v12, %s2552_s30 }
  0xcc   : > { %785 = vrot.lane.b32.xlu0 %v2692_v13, %s2552_s30 }
  0xcd   : > { %v552_v28 = vpop.permute.xlu1 %551  ;;  %v550_v29 = vpop.permute.xlu0 %549  ;;  %v2251_v30 = vpack.c.bf16 %v608_v23, %v606_v27  ;;  %v2253_v31 = vpack.c.bf16 %v607_v22, %v605_v25 }
  0xcf   : > { %803 = vrot.lane.b32.xlu1 %v2699_v14, %s2552_s30  ;;  %2252 = vmatprep.subr.bf16.mxu0 %v2251_v30 }
  0xd0   : > { %801 = vrot.lane.b32.xlu0 %v2702_v15, %s2552_s30  ;;  %2254 = vmatpush1.bf16.msra.mxu0 %v2253_v31  ;;  %v2202_v31 = vld [vmem:[%s4269_s1 + $0x6] sm:$0x3] }
  0xd1   : > { %v568_v32 = vpop.permute.xlu1 %567  ;;  %v566_v33 = vpop.permute.xlu0 %565 }
  0xd2   : > { %v581_v34 = vsel %vm577_vm2, %v552_v28, %v568_v32  ;;  %v589_v35 = vsel %vm577_vm2, %v568_v32, %v552_v28  ;;  %v580_v36 = vsel %vm577_vm2, %v550_v29, %v566_v33  ;;  %v588_v37 = vsel %vm577_vm2, %v566_v33, %v550_v29 }
  0xd3   : > { %v611_v38 = vmul.f32 %v2988_v59, %v589_v35  ;;  %v612_v39 = vmul.f32 %v2991_v60, %v581_v34  ;;  %v609_v40 = vmul.f32 %v2988_v59, %v588_v37  ;;  %v610_v43 = vmul.f32 %v2991_v60, %v580_v36  ;;  %851 = vrot.lane.b32.xlu1 %v2642_v3, %s2553_s15 }
  0xd4   : > { %849 = vrot.lane.b32.xlu0 %v2632_v1, %s2553_s15  ;;  %v3078_v36 = vrot.slane %v2202_v31, %v2799_v21  ;;  %v3081_v37 = vrot.slane %v2202_v31, %v2790_v19 }
  0xd5   : > { %v556_v44 = vpop.permute.xlu1 %555  ;;  %v554_v45 = vpop.permute.xlu0 %553  ;;  %v2255_v46 = vpack.c.bf16 %v612_v39, %v610_v43  ;;  %v2257_v47 = vpack.c.bf16 %v611_v38, %v609_v40 }
  0xd7   : > { %867 = vrot.lane.b32.xlu1 %v2639_v2, %s2553_s15  ;;  %2256 = vmatprep.subr.bf16.mxu0 %v2255_v46 }
  0xd8   : > { %865 = vrot.lane.b32.xlu0 %v2629_v0, %s2553_s15  ;;  %2258 = vmatpush1.bf16.msra.mxu0 %v2257_v47 }
  0xd9   : > { %v572_v48 = vpop.permute.xlu1 %571  ;;  %v570_v49 = vpop.permute.xlu0 %569 }
  0xda   : > { %v583_v50 = vsel %vm577_vm2, %v556_v44, %v572_v48  ;;  %v591_v51 = vsel %vm577_vm2, %v572_v48, %v556_v44  ;;  %v582_v52 = vsel %vm577_vm2, %v554_v45, %v570_v49  ;;  %v590_v53 = vsel %vm577_vm2, %v570_v49, %v554_v45 }
  0xdb   : > { %v615_v54 = vmul.f32 %v2988_v59, %v591_v51  ;;  %v616_v55 = vmul.f32 %v2991_v60, %v583_v50  ;;  %v613_v56 = vmul.f32 %v2988_v59, %v590_v53  ;;  %v614_v57 = vmul.f32 %v2991_v60, %v582_v52  ;;  %927 = vrot.lane.b32.xlu1 %v2642_v3, %s2554_s16 }
  0xdc   : > { %925 = vrot.lane.b32.xlu0 %v2632_v1, %s2554_s16 }
  0xdd   : > { %v560_v58 = vpop.permute.xlu1 %559  ;;  %v558_v61 = vpop.permute.xlu0 %557  ;;  %v2259_v62 = vpack.c.bf16 %v616_v55, %v614_v57  ;;  %v2261_v63 = vpack.c.bf16 %v615_v54, %v613_v56 }
  0xdf   : > { %943 = vrot.lane.b32.xlu1 %v2639_v2, %s2554_s16  ;;  %2260 = vmatprep.subr.bf16.mxu0 %v2259_v62 }
  0xe0   : > { %941 = vrot.lane.b32.xlu0 %v2629_v0, %s2554_s16  ;;  %2262 = vmatpush1.bf16.msra.mxu0 %v2261_v63 }
  0xe1   : > { %v576_v16 = vpop.permute.xlu1 %575  ;;  %v574_v17 = vpop.permute.xlu0 %573 }
  0xe2   : > { %v585_v20 = vsel %vm577_vm2, %v560_v58, %v576_v16  ;;  %v593_v22 = vsel %vm577_vm2, %v576_v16, %v560_v58  ;;  %v584_v23 = vsel %vm577_vm2, %v558_v61, %v574_v17  ;;  %v592_v25 = vsel %vm577_vm2, %v574_v17, %v558_v61 }
  0xe3   : > { %v619_v27 = vmul.f32 %v2988_v59, %v593_v22  ;;  %v620_v28 = vmul.f32 %v2991_v60, %v585_v20  ;;  %v617_v29 = vmul.f32 %v2988_v59, %v592_v25  ;;  %v618_v30 = vmul.f32 %v2991_v60, %v584_v23  ;;  %855 = vrot.lane.b32.xlu1 %v2649_v4, %s2553_s15 }
  0xe4   : > { %853 = vrot.lane.b32.xlu0 %v2652_v5, %s2553_s15 }
  0xe5   : > { %v624_v32 = vpop.permute.xlu1 %623  ;;  %v622_v33 = vpop.permute.xlu0 %621  ;;  %v2263_v34 = vpack.c.bf16 %v620_v28, %v618_v30  ;;  %v2265_v35 = vpack.c.bf16 %v619_v27, %v617_v29 }
  0xe7   : > { %871 = vrot.lane.b32.xlu1 %v2659_v6, %s2553_s15  ;;  %2264 = vmatprep.subr.bf16.mxu0 %v2263_v34 }
  0xe8   : > { %869 = vrot.lane.b32.xlu0 %v2662_v7, %s2553_s15  ;;  %2266 = vmatpush1.bf16.msra.mxu0 %v2265_v35 }
  0xe9   : > { %v640_v38 = vpop.permute.xlu1 %639  ;;  %v638_v39 = vpop.permute.xlu0 %637 }
  0xea   : > { %v655_v40 = vsel %vm653_vm3, %v624_v32, %v640_v38  ;;  %v663_v43 = vsel %vm653_vm3, %v640_v38, %v624_v32  ;;  %v654_v44 = vsel %vm653_vm3, %v622_v33, %v638_v39  ;;  %v662_v45 = vsel %vm653_vm3, %v638_v39, %v622_v33 }
  0xeb   : > { %v683_v46 = vmul.f32 %v3078_v36, %v663_v43  ;;  %v684_v47 = vmul.f32 %v3081_v37, %v655_v40  ;;  %v681_v48 = vmul.f32 %v3078_v36, %v662_v45  ;;  %v682_v49 = vmul.f32 %v3081_v37, %v654_v44  ;;  %931 = vrot.lane.b32.xlu1 %v2649_v4, %s2554_s16 }
  0xec   : > { %929 = vrot.lane.b32.xlu0 %v2652_v5, %s2554_s16 }
  0xed   : > { %v628_v50 = vpop.permute.xlu1 %627  ;;  %v626_v51 = vpop.permute.xlu0 %625  ;;  %v2267_v52 = vpack.c.bf16 %v684_v47, %v682_v49  ;;  %v2269_v53 = vpack.c.bf16 %v683_v46, %v681_v48 }
  0xef   : > { %947 = vrot.lane.b32.xlu1 %v2659_v6, %s2554_s16  ;;  %2268 = vmatprep.subr.bf16.mxu0 %v2267_v52 }
  0xf0   : > { %945 = vrot.lane.b32.xlu0 %v2662_v7, %s2554_s16  ;;  %2270 = vmatpush1.bf16.msra.mxu0 %v2269_v53 }
  0xf1   : > { %v644_v54 = vpop.permute.xlu1 %643  ;;  %v642_v55 = vpop.permute.xlu0 %641 }
  0xf2   : > { %v657_v56 = vsel %vm653_vm3, %v628_v50, %v644_v54  ;;  %v665_v57 = vsel %vm653_vm3, %v644_v54, %v628_v50  ;;  %v656_v58 = vsel %vm653_vm3, %v626_v51, %v642_v55  ;;  %v664_v61 = vsel %vm653_vm3, %v642_v55, %v626_v51 }
  0xf3   : > { %v687_v62 = vmul.f32 %v3078_v36, %v665_v57  ;;  %v688_v63 = vmul.f32 %v3081_v37, %v657_v56  ;;  %v685_v16 = vmul.f32 %v3078_v36, %v664_v61  ;;  %v686_v17 = vmul.f32 %v3081_v37, %v656_v58  ;;  %859 = vrot.lane.b32.xlu1 %v2669_v8, %s2553_s15 }
  0xf4   : > { %857 = vrot.lane.b32.xlu0 %v2672_v9, %s2553_s15  ;;  %v2283_v58 = vpack.c.bf16 %v2639_v2, %v2629_v0  ;;  %v2287_v0 = vpack.c.bf16 %v2659_v6, %v2662_v7  ;;  %v1007_v2 = vld [vmem:[%s4270_s2 + $0x30] sm:$0xff]  ;;  %v1006_v6 = vld [vmem:[%s4270_s2 + $0x28] sm:$0xff] }
  0xf5   : > { %v632_v20 = vpop.permute.xlu1 %631  ;;  %v630_v22 = vpop.permute.xlu0 %629  ;;  %v2271_v23 = vpack.c.bf16 %v688_v63, %v686_v17  ;;  %v2273_v25 = vpack.c.bf16 %v687_v62, %v685_v16  ;;  %v1001_v63 = vld [vmem:[%s4270_s2] sm:$0xff]  ;;  %v2285_v16 = vpack.c.bf16 %v2642_v3, %v2632_v1  ;;  %v2289_v3 = vpack.c.bf16 %v2649_v4, %v2652_v5 }
  0xf7   : > { %875 = vrot.lane.b32.xlu1 %v2679_v10, %s2553_s15  ;;  %2272 = vmatprep.subr.bf16.mxu0 %v2271_v23  ;;  %v2291_v23 = vpack.c.bf16 %v2679_v10, %v2682_v11 }
  0xf8   : > { %873 = vrot.lane.b32.xlu0 %v2682_v11, %s2553_s15  ;;  %2274 = vmatpush1.bf16.msra.mxu0 %v2273_v25  ;;  %v1012_v25 = vld [vmem:[%s4270_s2 + $0x58] sm:$0xff] }
  0xf9   : > { %v648_v27 = vpop.permute.xlu1 %647  ;;  %v646_v28 = vpop.permute.xlu0 %645 }
  0xfa   : > { %v659_v29 = vsel %vm653_vm3, %v632_v20, %v648_v27  ;;  %v667_v30 = vsel %vm653_vm3, %v648_v27, %v632_v20  ;;  %v658_v31 = vsel %vm653_vm3, %v630_v22, %v646_v28  ;;  %v666_v32 = vsel %vm653_vm3, %v646_v28, %v630_v22  ;;  %v2203_v22 = vld [vmem:[%s4269_s1 + $0xa] sm:$0x3]  ;;  %v1011_v28 = vld [vmem:[%s4270_s2 + $0x50] sm:$0xff] }
  0xfb   : > { %v691_v33 = vmul.f32 %v3078_v36, %v667_v30  ;;  %v692_v34 = vmul.f32 %v3081_v37, %v659_v29  ;;  %v689_v35 = vmul.f32 %v3078_v36, %v666_v32  ;;  %v690_v38 = vmul.f32 %v3081_v37, %v658_v31  ;;  %935 = vrot.lane.b32.xlu1 %v2669_v8, %s2554_s16  ;;  %v1017_v32 = vld [vmem:[%s4270_s2 + $0x80] sm:$0xff] }
  0xfc   : > { %933 = vrot.lane.b32.xlu0 %v2672_v9, %s2554_s16  ;;  %v4279_v20 = vmov 0.0   ;;  %v3197_v27 = vrot.slane %v2203_v22, %v2790_v19  ;;  %v3213_v29 = vrot.slane %v2203_v22, %v2799_v21  ;;  %v2295_v31 = vpack.c.bf16 %v2699_v14, %v2702_v15 }
  0xfd   : > { %v636_v39 = vpop.permute.xlu1 %635  ;;  %v634_v40 = vpop.permute.xlu0 %633  ;;  %v2275_v43 = vpack.c.bf16 %v692_v34, %v690_v38  ;;  %v2277_v44 = vpack.c.bf16 %v691_v33, %v689_v35  ;;  %1300 = vmatprep.mubr.f32.mxu1 %v4279_v20  ;;  %v2297_v38 = vpack.c.bf16 %v2689_v12, %v2692_v13 }
  0xff   : > { %951 = vrot.lane.b32.xlu1 %v2679_v10, %s2554_s16  ;;  %2276 = vmatprep.subr.bf16.mxu0 %v2275_v43 }
 0x100   : > { %949 = vrot.lane.b32.xlu0 %v2682_v11, %s2554_s16  ;;  %2278 = vmatpush1.bf16.msra.mxu0 %v2277_v44  ;;  %v2293_v11 = vpack.c.bf16 %v2669_v8, %v2672_v9 }
 0x101   : > { %v652_v45 = vpop.permute.xlu1 %651  ;;  %v650_v46 = vpop.permute.xlu0 %649 }
 0x102   : > { %v661_v47 = vsel %vm653_vm3, %v636_v39, %v652_v45  ;;  %v669_v48 = vsel %vm653_vm3, %v652_v45, %v636_v39  ;;  %v660_v49 = vsel %vm653_vm3, %v634_v40, %v650_v46  ;;  %v668_v50 = vsel %vm653_vm3, %v650_v46, %v634_v40  ;;  %v1016_v39 = vld [vmem:[%s4270_s2 + $0x78] sm:$0xff] }
 0x103   : > { %v695_v51 = vmul.f32 %v3078_v36, %v669_v48  ;;  %v696_v52 = vmul.f32 %v3081_v37, %v661_v47  ;;  %v693_v53 = vmul.f32 %v3078_v36, %v668_v50  ;;  %v694_v54 = vmul.f32 %v3081_v37, %v660_v49  ;;  %863 = vrot.lane.b32.xlu1 %v2689_v12, %s2553_s15  ;;  %v1004_v45 = vld [vmem:[%s4270_s2 + $0x18] sm:$0xff]  ;;  %v1021_v49 = vld [vmem:[%s4271_s3] sm:$0xff] }
 0x104   : > { %861 = vrot.lane.b32.xlu0 %v2692_v13, %s2553_s15 }
 0x105   : > { %v700_v55 = vpop.permute.xlu1 %699  ;;  %v2279_v56 = vpack.c.bf16 %v696_v52, %v694_v54  ;;  %v2281_v57 = vpack.c.bf16 %v695_v51, %v693_v53 }
 0x106   : > { %v698_v61 = vpop.permute.xlu0 %697 }
 0x107   : > { %879 = vrot.lane.b32.xlu1 %v2699_v14, %s2553_s15  ;;  %2280 = vmatprep.subr.bf16.mxu0 %v2279_v56  ;;  %v1022_v56 = vld [vmem:[%s4271_s3 + $0x8] sm:$0xff] }
 0x108   : > { %877 = vrot.lane.b32.xlu0 %v2702_v15, %s2553_s15  ;;  %2282 = vmatpush1.bf16.msra.mxu0 %v2281_v57 }
 0x109   : > { %v716_v62 = vpop.permute.xlu1 %715  ;;  %2284 = vmatprep.subr.bf16.mxu0 %v2283_v58 }
 0x10a   : > { %v714_v17 = vpop.permute.xlu0 %713  ;;  %v739_v4 = vsel %vm729_vm4, %v716_v62, %v700_v55  ;;  %v731_v8 = vsel %vm729_vm4, %v700_v55, %v716_v62  ;;  %v2556_v55 = vmov 0  }
 0x10b   : > { %939 = vrot.lane.b32.xlu1 %v2689_v12, %s2554_s16  ;;  %1123 = vmatmul.mubr.f32.vlgmr.msra.gmra.mrb[0].mxu0 %v1001_v63  ;;  %v738_v5 = vsel %vm729_vm4, %v714_v17, %v698_v61  ;;  %v760_v9 = vmul.f32 %v3197_v27, %v739_v4  ;;  %v730_v33 = vsel %vm729_vm4, %v698_v61, %v714_v17 }
 0x10c   : > { %937 = vrot.lane.b32.xlu0 %v2692_v13, %s2554_s16  ;;  %2286 = vmatpush1.bf16.msra.mxu0 %v2285_v16  ;;  %v758_v34 = vmul.f32 %v3197_v27, %v738_v5  ;;  %v759_v40 = vmul.f32 %v3213_v29, %v731_v8  ;;  %v757_v43 = vmul.f32 %v3213_v29, %v730_v33  ;;  %v2204_v33 = vld [vmem:[%s4269_s1 + $0xc] sm:$0x3] }
 0x10d   : > { %v704_v1 = vpop.permute.xlu1 %703  ;;  %1128 = vmatprep.mubr.f32.mxu0 %v1007_v2  ;;  %2288 = vmatprep.subr.bf16.mxu0 %v2287_v0  ;;  %v1024_v0 = vld [vmem:[%s4271_s3 + $0x18] sm:$0xff] }
 0x10e   : > { %v702_v7 = vpop.permute.xlu0 %701  ;;  %v2299_v47 = vpack.c.bf16 %v760_v9, %v758_v34  ;;  %v2301_v51 = vpack.c.bf16 %v759_v40, %v757_v43  ;;  %2537 = vset.pattern.permute.xlu0 %v2556_v55  ;;  %2538 = vset.pattern.permute.xlu1 %v2556_v55 }
 0x10f   : > { %955 = vrot.lane.b32.xlu1 %v2699_v14, %s2554_s16  ;;  %1129 = vmatmul.mubr.f32.gmra.mrb[2].mxu0 %v1006_v6  ;;  %v1023_v6 = vld [vmem:[%s4271_s3 + $0x10] sm:$0xff] }
 0x110   : > { %953 = vrot.lane.b32.xlu0 %v2702_v15, %s2554_s16  ;;  %2290 = vmatpush1.bf16.msra.mxu0 %v2289_v3 }
 0x111   : > { %v720_v10 = vpop.permute.xlu1 %719  ;;  %1134 = vmatprep.mubr.f32.mxu0 %v1012_v25  ;;  %2292 = vmatprep.subr.bf16.mxu0 %v2291_v23 }
 0x112   : > { %v718_v30 = vpop.permute.xlu0 %717  ;;  %v741_v35 = vsel %vm729_vm4, %v720_v10, %v704_v1  ;;  %v733_v46 = vsel %vm729_vm4, %v704_v1, %v720_v10 }
 0x113   : > { %1135 = vmatmul.mubr.f32.gmra.mrb[4].mxu0 %v1011_v28  ;;  %v740_v14 = vsel %vm729_vm4, %v718_v30, %v702_v7  ;;  %v764_v12 = vmul.f32 %v3197_v27, %v741_v35  ;;  %v732_v13 = vsel %vm729_vm4, %v702_v7, %v718_v30  ;;  %v763_v52 = vmul.f32 %v3213_v29, %v733_v46 }
 0x114   : > { %2294 = vmatpush1.bf16.msra.mxu0 %v2293_v11  ;;  %1140 = vmatprep.mubr.f32.mxu0 %v1017_v32  ;;  %v762_v48 = vmul.f32 %v3197_v27, %v740_v14  ;;  %v761_v57 = vmul.f32 %v3213_v29, %v732_v13 }
 0x115   : > { %v708_v15 = vpop.permute.xlu1 %707  ;;  %2296 = vmatprep.subr.bf16.mxu0 %v2295_v31  ;;  %1027 = vperm.xlu0 %2537, %v1021_v49  }
 0x116   : > { %v706_v44 = vpop.permute.xlu0 %705  ;;  %v2303_v17 = vpack.c.bf16 %v764_v12, %v762_v48  ;;  %1032 = vperm.xlu1 %2538, %v1022_v56   ;;  %v2305_v7 = vpack.c.bf16 %v763_v52, %v761_v57 }
 0x117   : > { %1141 = vmatmul.mubr.f32.gmra.mrb[6].mxu0 %v1016_v39  ;;  %v3292_v39 = vrot.slane %v2204_v33, %v2790_v19 }
 0x118   : > { %2298 = vmatpush1.bf16.msra.mxu0 %v2297_v38  ;;  %1211 = vmatprep.mubr.f32.mxu0 %v1004_v45  ;;  %v3289_v38 = vrot.slane %v2204_v33, %v2799_v21 }
 0x119   : > { %v724_v50 = vpop.permute.xlu1 %723  ;;  %2300 = vmatprep.subr.bf16.mxu0 %v2299_v47  ;;  %1042 = vperm.xlu0 %2537, %v1024_v0  }
 0x11a   : > { %v743_v53 = vsel %vm729_vm4, %v724_v50, %v708_v15  ;;  %v722_v54 = vpop.permute.xlu0 %721  ;;  %v735_v58 = vsel %vm729_vm4, %v708_v15, %v724_v50  ;;  %1037 = vperm.xlu1 %2538, %v1023_v6  }
 0x11b   : > { %v734_v61 = vsel %vm729_vm4, %v706_v44, %v722_v54  ;;  %v742_v62 = vsel %vm729_vm4, %v722_v54, %v706_v44  ;;  %v768_v63 = vmul.f32 %v3197_v27, %v743_v53  ;;  %v767_v22 = vmul.f32 %v3213_v29, %v735_v58 }
 0x11c   : > { %v766_v16 = vmul.f32 %v3197_v27, %v742_v62  ;;  %2302 = vmatpush1.bf16.msra.mxu0 %v2301_v51  ;;  %v765_v1 = vmul.f32 %v3213_v29, %v734_v61 }
 0x11d   : > { %v712_v2 = vpop.permute.xlu1 %711  ;;  %2304 = vmatprep.subr.bf16.mxu0 %v2303_v17 }
 0x11e   : > { %v710_v3 = vpop.permute.xlu0 %709  ;;  %v2307_v23 = vpack.c.bf16 %v768_v63, %v766_v16  ;;  %v2309_v4 = vpack.c.bf16 %v767_v22, %v765_v1 }
 0x120   : > { %2306 = vmatpush1.bf16.msra.mxu0 %v2305_v7 }
 0x121   : > { %v728_v25 = vpop.permute.xlu1 %727  ;;  %2308 = vmatprep.subr.bf16.mxu0 %v2307_v23 }
 0x122   : > { %v737_v5 = vsel %vm729_vm4, %v712_v2, %v728_v25  ;;  %v745_v10 = vsel %vm729_vm4, %v728_v25, %v712_v2  ;;  %v726_v11 = vpop.permute.xlu0 %725 }
 0x123   : > { %v771_v28 = vmul.f32 %v3213_v29, %v737_v5  ;;  %v772_v30 = vmul.f32 %v3197_v27, %v745_v10  ;;  %v736_v31 = vsel %vm729_vm4, %v710_v3, %v726_v11  ;;  %v744_v32 = vsel %vm729_vm4, %v726_v11, %v710_v3 }
 0x124   : > { %v769_v8 = vmul.f32 %v3213_v29, %v736_v31  ;;  %v770_v9 = vmul.f32 %v3197_v27, %v744_v32  ;;  %2310 = vmatpush1.bf16.msra.mxu0 %v2309_v4 }
 0x125   : > { %v776_v34 = vpop.permute.xlu1 %775 }
 0x126   : > { %v2313_v35 = vpack.c.bf16 %v771_v28, %v769_v8  ;;  %v774_v14 = vpop.permute.xlu0 %773  ;;  %v2311_v15 = vpack.c.bf16 %v772_v30, %v770_v9 }
 0x128   : > { %2312 = vmatprep.subr.bf16.mxu0 %v2311_v15 }
 0x129   : > { %2314 = vmatpush1.bf16.msra.mxu0 %v2313_v35  ;;  %v792_v40 = vpop.permute.xlu1 %791 }
 0x12a   : > { %v807_v43 = vsel %vm805_vm5, %v776_v34, %v792_v40  ;;  %v815_v44 = vsel %vm805_vm5, %v792_v40, %v776_v34  ;;  %v790_v45 = vpop.permute.xlu0 %789 }
 0x12b   : > { %v835_v46 = vmul.f32 %v3289_v38, %v807_v43  ;;  %v836_v47 = vmul.f32 %v3292_v39, %v815_v44  ;;  %v806_v12 = vsel %vm805_vm5, %v774_v14, %v790_v45  ;;  %v814_v13 = vsel %vm805_vm5, %v790_v45, %v774_v14 }
 0x12c   : > { %v833_v48 = vmul.f32 %v3289_v38, %v806_v12  ;;  %v834_v49 = vmul.f32 %v3292_v39, %v814_v13 }
 0x12d   : > { %v780_v50 = vpop.permute.xlu1 %779 }
 0x12e   : > { %v2317_v51 = vpack.c.bf16 %v835_v46, %v833_v48  ;;  %v778_v52 = vpop.permute.xlu0 %777  ;;  %v2315_v53 = vpack.c.bf16 %v836_v47, %v834_v49  ;;  %v2205_v46 = vld [vmem:[%s4269_s1 + $0xe] sm:$0x3] }
 0x12f   : > { %v3347_v49 = vrot.slane %v2205_v46, %v2799_v21 }
 0x130   : > { %2316 = vmatprep.subr.bf16.mxu0 %v2315_v53 }
 0x131   : > { %2318 = vmatpush1.bf16.msra.mxu0 %v2317_v51  ;;  %v796_v54 = vpop.permute.xlu1 %795  ;;  %4287 = vst [vmem:[#allocation2_spill] sm:$0xff] %v3347_v49 }
 0x132   : > { %v809_v55 = vsel %vm805_vm5, %v780_v50, %v796_v54  ;;  %v817_v56 = vsel %vm805_vm5, %v796_v54, %v780_v50  ;;  %v794_v57 = vpop.permute.xlu0 %793  ;;  %v3350_v50 = vrot.slane %v2205_v46, %v2790_v19 }
 0x133   : > { %v839_v58 = vmul.f32 %v3289_v38, %v809_v55  ;;  %v840_v61 = vmul.f32 %v3292_v39, %v817_v56  ;;  %v808_v62 = vsel %vm805_vm5, %v778_v52, %v794_v57  ;;  %v816_v63 = vsel %vm805_vm5, %v794_v57, %v778_v52 }
 0x134   : > { %v837_v16 = vmul.f32 %v3289_v38, %v808_v62  ;;  %v838_v17 = vmul.f32 %v3292_v39, %v816_v63  ;;  %v2206_v63 = vld [vmem:[%s4269_s1 + $0x10] sm:$0x3] }
 0x135   : > { %v784_v0 = vpop.permute.xlu1 %783 }
 0x136   : > { %v2321_v2 = vpack.c.bf16 %v839_v58, %v837_v16  ;;  %v782_v22 = vpop.permute.xlu0 %781  ;;  %v2319_v1 = vpack.c.bf16 %v840_v61, %v838_v17 }
 0x138   : > { %2320 = vmatprep.subr.bf16.mxu0 %v2319_v1  ;;  %v3372_v1 = vrot.slane %v2206_v63, %v2799_v21 }
 0x139   : > { %2322 = vmatpush1.bf16.msra.mxu0 %v2321_v2  ;;  %v800_v3 = vpop.permute.xlu1 %799 }
 0x13a   : > { %v811_v6 = vsel %vm805_vm5, %v784_v0, %v800_v3  ;;  %v819_v7 = vsel %vm805_vm5, %v800_v3, %v784_v0  ;;  %v798_v23 = vpop.permute.xlu0 %797  ;;  %4289 = vst [vmem:[#allocation4_spill] sm:$0xff] %v3372_v1 }
 0x13b   : > { %v843_v25 = vmul.f32 %v3289_v38, %v811_v6  ;;  %v844_v4 = vmul.f32 %v3292_v39, %v819_v7  ;;  %v810_v5 = vsel %vm805_vm5, %v782_v22, %v798_v23  ;;  %v818_v10 = vsel %vm805_vm5, %v798_v23, %v782_v22 }
 0x13c   : > { %v841_v11 = vmul.f32 %v3289_v38, %v810_v5  ;;  %v842_v28 = vmul.f32 %v3292_v39, %v818_v10  ;;  %v3369_v22 = vrot.slane %v2206_v63, %v2790_v19 }
 0x13d   : > { %v788_v30 = vpop.permute.xlu1 %787 }
 0x13e   : > { %v2325_v31 = vpack.c.bf16 %v843_v25, %v841_v11  ;;  %v786_v32 = vpop.permute.xlu0 %785  ;;  %v2323_v8 = vpack.c.bf16 %v844_v4, %v842_v28  ;;  %4288 = vst [vmem:[#allocation3_spill] sm:$0xff] %v3369_v22 }
 0x140   : > { %2324 = vmatprep.subr.bf16.mxu0 %v2323_v8 }
 0x141   : > { %2326 = vmatpush1.bf16.msra.mxu0 %v2325_v31  ;;  %v804_v9 = vpop.permute.xlu1 %803 }
 0x142   : > { %v813_v33 = vsel %vm805_vm5, %v788_v30, %v804_v9  ;;  %v821_v34 = vsel %vm805_vm5, %v804_v9, %v788_v30  ;;  %v802_v35 = vpop.permute.xlu0 %801 }
 0x143   : > { %v847_v14 = vmul.f32 %v3289_v38, %v813_v33  ;;  %v848_v15 = vmul.f32 %v3292_v39, %v821_v34  ;;  %v812_v40 = vsel %vm805_vm5, %v786_v32, %v802_v35  ;;  %v820_v43 = vsel %vm805_vm5, %v802_v35, %v786_v32 }
 0x144   : > { %v845_v44 = vmul.f32 %v3289_v38, %v812_v40  ;;  %v846_v45 = vmul.f32 %v3292_v39, %v820_v43 }
 0x145   : > { %v852_v47 = vpop.permute.xlu1 %851 }
 0x146   : > { %v2329_v12 = vpack.c.bf16 %v847_v14, %v845_v44  ;;  %v850_v13 = vpop.permute.xlu0 %849  ;;  %v2327_v48 = vpack.c.bf16 %v848_v15, %v846_v45 }
 0x148   : > { %2328 = vmatprep.subr.bf16.mxu0 %v2327_v48 }
 0x149   : > { %2330 = vmatpush1.bf16.msra.mxu0 %v2329_v12  ;;  %v868_v51 = vpop.permute.xlu1 %867 }
 0x14a   : > { %v883_v52 = vsel %vm881_vm6, %v852_v47, %v868_v51  ;;  %v891_v53 = vsel %vm881_vm6, %v868_v51, %v852_v47  ;;  %v866_v54 = vpop.permute.xlu0 %865 }
 0x14b   : > { %v911_v55 = vmul.f32 %v3347_v49, %v883_v52  ;;  %v912_v56 = vmul.f32 %v3350_v50, %v891_v53  ;;  %v882_v57 = vsel %vm881_vm6, %v850_v13, %v866_v54  ;;  %v890_v58 = vsel %vm881_vm6, %v866_v54, %v850_v13 }
 0x14c   : > { %v909_v61 = vmul.f32 %v3347_v49, %v882_v57  ;;  %v910_v62 = vmul.f32 %v3350_v50, %v890_v58 }
 0x14d   : > { %v928_v16 = vpop.permute.xlu1 %927 }
 0x14e   : > { %v2333_v17 = vpack.c.bf16 %v911_v55, %v909_v61  ;;  %v926_v0 = vpop.permute.xlu0 %925  ;;  %v2331_v2 = vpack.c.bf16 %v912_v56, %v910_v62 }
 0x150   : > { %2332 = vmatprep.subr.bf16.mxu0 %v2331_v2 }
 0x151   : > { %2334 = vmatpush1.bf16.msra.mxu0 %v2333_v17  ;;  %v944_v3 = vpop.permute.xlu1 %943 }
 0x152   : > { %v959_v6 = vsel %vm957_vm7, %v928_v16, %v944_v3  ;;  %v942_v7 = vpop.permute.xlu0 %941  ;;  %v967_v23 = vsel %vm957_vm7, %v944_v3, %v928_v16 }
 0x153   : > { %v958_v25 = vsel %vm957_vm7, %v926_v0, %v942_v7  ;;  %v966_v19 = vsel %vm957_vm7, %v942_v7, %v926_v0  ;;  %v988_v4 = vmul.f32 %v3369_v22, %v967_v23  ;;  %v987_v21 = vmul.f32 %v3372_v1, %v959_v6 }
 0x154   : > { %v986_v5 = vmul.f32 %v3369_v22, %v966_v19  ;;  %v985_v10 = vmul.f32 %v3372_v1, %v958_v25 }
 0x155   : > { %v856_v11 = vpop.permute.xlu1 %855 }
 0x156   : > { %v854_v28 = vpop.permute.xlu0 %853  ;;  %v2347_v30 = vpack.c.bf16 %v988_v4, %v986_v5  ;;  %v2349_v31 = vpack.c.bf16 %v987_v21, %v985_v10 }
 0x158   : > { %2348 = vmatprep.subr.bf16.mxu1 %v2347_v30 }
 0x159   : > { %2350 = vmatpush1.bf16.msra.mxu1 %v2349_v31  ;;  %v872_v32 = vpop.permute.xlu1 %871 }
 0x15a   : > { %v885_v8 = vsel %vm881_vm6, %v856_v11, %v872_v32  ;;  %v893_v9 = vsel %vm881_vm6, %v872_v32, %v856_v11  ;;  %v870_v33 = vpop.permute.xlu0 %869 }
 0x15b   : > { %v915_v34 = vmul.f32 %v3347_v49, %v885_v8  ;;  %v916_v35 = vmul.f32 %v3350_v50, %v893_v9  ;;  %v884_v14 = vsel %vm881_vm6, %v854_v28, %v870_v33  ;;  %v892_v15 = vsel %vm881_vm6, %v870_v33, %v854_v28 }
 0x15c   : > { %v913_v40 = vmul.f32 %v3347_v49, %v884_v14  ;;  %v914_v43 = vmul.f32 %v3350_v50, %v892_v15 }
 0x15d   : > { %v932_v44 = vpop.permute.xlu1 %931 }
 0x15e   : > { %v2337_v45 = vpack.c.bf16 %v915_v34, %v913_v40  ;;  %v930_v46 = vpop.permute.xlu0 %929  ;;  %v2335_v47 = vpack.c.bf16 %v916_v35, %v914_v43 }
 0x160   : > { %2336 = vmatprep.subr.bf16.mxu0 %v2335_v47 }
 0x161   : > { %2338 = vmatpush1.bf16.msra.mxu0 %v2337_v45  ;;  %v948_v12 = vpop.permute.xlu1 %947 }
 0x162   : > { %v961_v13 = vsel %vm957_vm7, %v932_v44, %v948_v12  ;;  %v969_v48 = vsel %vm957_vm7, %v948_v12, %v932_v44  ;;  %v946_v51 = vpop.permute.xlu0 %945 }
 0x163   : > { %v991_v52 = vmul.f32 %v3372_v1, %v961_v13  ;;  %v992_v53 = vmul.f32 %v3369_v22, %v969_v48  ;;  %v960_v54 = vsel %vm957_vm7, %v930_v46, %v946_v51  ;;  %v968_v55 = vsel %vm957_vm7, %v946_v51, %v930_v46 }
 0x164   : > { %v989_v56 = vmul.f32 %v3372_v1, %v960_v54  ;;  %v990_v57 = vmul.f32 %v3369_v22, %v968_v55 }
 0x165   : > { %v860_v58 = vpop.permute.xlu1 %859 }
 0x166   : > { %v858_v61 = vpop.permute.xlu0 %857  ;;  %v2351_v62 = vpack.c.bf16 %v992_v53, %v990_v57  ;;  %v2353_v63 = vpack.c.bf16 %v991_v52, %v989_v56 }
 0x168   : > { %2352 = vmatprep.subr.bf16.mxu1 %v2351_v62 }
 0x169   : > { %2354 = vmatpush1.bf16.msra.mxu1 %v2353_v63  ;;  %v876_v16 = vpop.permute.xlu1 %875 }
 0x16a   : > { %v887_v17 = vsel %vm881_vm6, %v860_v58, %v876_v16  ;;  %v895_v0 = vsel %vm881_vm6, %v876_v16, %v860_v58  ;;  %v874_v2 = vpop.permute.xlu0 %873 }
 0x16b   : > { %v919_v3 = vmul.f32 %v3347_v49, %v887_v17  ;;  %v920_v6 = vmul.f32 %v3350_v50, %v895_v0  ;;  %v886_v7 = vsel %vm881_vm6, %v858_v61, %v874_v2  ;;  %v894_v23 = vsel %vm881_vm6, %v874_v2, %v858_v61  ;;  %v1003_v61 = vld [vmem:[%s4270_s2 + $0x10] sm:$0xff]  ;;  %v1009_v17 = vld [vmem:[%s4270_s2 + $0x40] sm:$0xff] }
 0x16c   : > { %v917_v25 = vmul.f32 %v3347_v49, %v886_v7  ;;  %v918_v19 = vmul.f32 %v3350_v50, %v894_v23 }
 0x16d   : > { %v936_v4 = vpop.permute.xlu1 %935 }
 0x16e   : > { %v2341_v21 = vpack.c.bf16 %v919_v3, %v917_v25  ;;  %v934_v5 = vpop.permute.xlu0 %933  ;;  %v2339_v10 = vpack.c.bf16 %v920_v6, %v918_v19  ;;  %v1008_v25 = vld [vmem:[%s4270_s2 + $0x38] sm:$0xff] }
 0x170   : > { %2340 = vmatprep.subr.bf16.mxu0 %v2339_v10  ;;  %v1005_v10 = vld [vmem:[%s4270_s2 + $0x20] sm:$0xff] }
 0x171   : > { %2342 = vmatpush1.bf16.msra.mxu0 %v2341_v21  ;;  %v952_v11 = vpop.permute.xlu1 %951  ;;  %v1014_v21 = vld [vmem:[%s4270_s2 + $0x68] sm:$0xff] }
 0x172   : > { %v963_v28 = vsel %vm957_vm7, %v936_v4, %v952_v11  ;;  %v971_v30 = vsel %vm957_vm7, %v952_v11, %v936_v4  ;;  %v950_v31 = vpop.permute.xlu0 %949  ;;  %v1019_v11 = vld [vmem:[%s4270_s2 + $0x90] sm:$0xff] }
 0x173   : > { %v995_v32 = vmul.f32 %v3372_v1, %v963_v28  ;;  %v996_v8 = vmul.f32 %v3369_v22, %v971_v30  ;;  %v962_v9 = vsel %vm957_vm7, %v934_v5, %v950_v31  ;;  %v970_v33 = vsel %vm957_vm7, %v950_v31, %v934_v5  ;;  %v1013_v5 = vld [vmem:[%s4270_s2 + $0x60] sm:$0xff]  ;;  %v1018_v28 = vld [vmem:[%s4270_s2 + $0x88] sm:$0xff]  ;;  %v1015_v31 = vld [vmem:[%s4270_s2 + $0x70] sm:$0xff] }
 0x174   : > { %v993_v34 = vmul.f32 %v3372_v1, %v962_v9  ;;  %v994_v35 = vmul.f32 %v3369_v22, %v970_v33  ;;  %v1010_v30 = vld [vmem:[%s4270_s2 + $0x48] sm:$0xff] }
 0x175   : > { %v864_v14 = vpop.permute.xlu1 %863 }
 0x176   : > { %v862_v15 = vpop.permute.xlu0 %861  ;;  %v2355_v40 = vpack.c.bf16 %v996_v8, %v994_v35  ;;  %v2357_v43 = vpack.c.bf16 %v995_v32, %v993_v34  ;;  %v1020_v32 = vld [vmem:[%s4270_s2 + $0x98] sm:$0xff] }
 0x178   : > { %2356 = vmatprep.subr.bf16.mxu1 %v2355_v40 }
 0x179   : > { %2358 = vmatpush1.bf16.msra.mxu1 %v2357_v43  ;;  %v880_v44 = vpop.permute.xlu1 %879 }
 0x17a   : > { %v889_v45 = vsel %vm881_vm6, %v864_v14, %v880_v44  ;;  %v897_v46 = vsel %vm881_vm6, %v880_v44, %v864_v14  ;;  %v878_v47 = vpop.permute.xlu0 %877 }
 0x17b   : > { %v923_v12 = vmul.f32 %v3347_v49, %v889_v45  ;;  %v924_v13 = vmul.f32 %v3350_v50, %v897_v46  ;;  %v888_v48 = vsel %vm881_vm6, %v862_v15, %v878_v47  ;;  %v896_v51 = vsel %vm881_vm6, %v878_v47, %v862_v15 }
 0x17c   : > { %v921_v52 = vmul.f32 %v3347_v49, %v888_v48  ;;  %v922_v53 = vmul.f32 %v3350_v50, %v896_v51 }
 0x17d   : > { %v940_v54 = vpop.permute.xlu1 %939 }
 0x17e   : > { %v2345_v55 = vpack.c.bf16 %v923_v12, %v921_v52  ;;  %v938_v56 = vpop.permute.xlu0 %937  ;;  %v2343_v57 = vpack.c.bf16 %v924_v13, %v922_v53 }
 0x180   : > { %2344 = vmatprep.subr.bf16.mxu0 %v2343_v57 }
 0x181   : > { %2346 = vmatpush1.bf16.msra.mxu0 %v2345_v55  ;;  %v956_v58 = vpop.permute.xlu1 %955 }
 0x182   : > { %v965_v62 = vsel %vm957_vm7, %v940_v54, %v956_v58  ;;  %v973_v63 = vsel %vm957_vm7, %v956_v58, %v940_v54  ;;  %v954_v16 = vpop.permute.xlu0 %953 }
 0x183   : > { %v999_v0 = vmul.f32 %v3372_v1, %v965_v62  ;;  %v1000_v2 = vmul.f32 %v3369_v22, %v973_v63  ;;  %v964_v3 = vsel %vm957_vm7, %v938_v56, %v954_v16  ;;  %v972_v6 = vsel %vm957_vm7, %v954_v16, %v938_v56 }
 0x184   : > { %v997_v7 = vmul.f32 %v3372_v1, %v964_v3  ;;  %v998_v23 = vmul.f32 %v3369_v22, %v972_v6  ;;  %1212 = vmatmul.mubr.f32.vlgmr.msra.gmra.mrb[0].mxu0 %v1003_v61 }
 0x185   : > { %1217 = vmatprep.mubr.f32.mxu0 %v1009_v17 }
 0x186   : > { %v2359_v19 = vpack.c.bf16 %v1000_v2, %v998_v23  ;;  %v2361_v4 = vpack.c.bf16 %v999_v0, %v997_v7 }
 0x188   : > { %1218 = vmatmul.mubr.f32.gmra.mrb[2].mxu0 %v1008_v25  ;;  %2360 = vmatprep.subr.bf16.mxu1 %v2359_v19 }
 0x189   : > { %2362 = vmatpush1.bf16.msra.mxu1 %v2361_v4  ;;  %1223 = vmatprep.mubr.f32.mxu0 %v1014_v21 }
 0x18c   : > { %1224 = vmatmul.mubr.f32.gmra.mrb[4].mxu0 %v1013_v5  ;;  %2207 = vmatmul.mubr.msk.f32.vlgmr.msra.gmra.mrb[0].mxu1 %vm1045_vm8, %v1005_v10 }
 0x18d   : > { %1229 = vmatprep.mubr.f32.mxu0 %v1019_v11  ;;  %1306 = vmatprep.mubr.f32.mxu1 %v4279_v20 }
 0x190   : > { %1230 = vmatmul.mubr.f32.gmra.mrb[6].mxu0 %v1018_v28  ;;  %2208 = vmatmul.mubr.msk.f32.gmra.mrb[2].mxu1 %vm1045_vm8, %v1010_v30 }
 0x191   : > { %1312 = vmatprep.mubr.f32.mxu1 %v4279_v20 }
 0x194   : > { %2209 = vmatmul.mubr.msk.f32.gmra.mrb[4].mxu1 %vm1045_vm8, %v1015_v31  ;;  %v1028_v33 = vpop.permute.xlu0 %1027 }
 0x195   : > { %1318 = vmatprep.mubr.f32.mxu1 %v4279_v20  ;;  %v1033_v35 = vpop.permute.xlu1 %1032 }
 0x198   : > { %2210 = vmatmul.mubr.msk.f32.gmra.mrb[6].mxu1 %vm1045_vm8, %v1020_v32  ;;  %v1043_v2 = vpop.permute.xlu0 %1042  ;;  %v1590_v32 = vld [vmem:[%s4272_s4 + $0x8] sm:$0xff] }
 0x199   : > { %v1038_v48 = vpop.permute.xlu1 %1037  ;;  %1678 = vmatprep.mubr.f32.mxu1 %v1590_v32 }
 0x257   : > { %v1213_v8 = vpop.f32.mrb[0].mxu0 }
 0x258   : > { %v1215_v9 = vpop.f32.mrb[1].mxu0  ;;  %v2487_v15 = vadd.f32 %v1213_v8, %v1028_v33 }
 0x259   : > { %v2489_v40 = vadd.f32 %v1215_v9, %v1028_v33 }
 0x25b   : > { %v1219_v34 = vpop.f32.mrb[2].mxu0 }
 0x25c   : > { %v1221_v14 = vpop.f32.mrb[3].mxu0  ;;  %v2491_v13 = vadd.f32 %v1219_v34, %v1033_v35 }
 0x25d   : > { %v2493_v52 = vadd.f32 %v1221_v14, %v1033_v35  ;;  %v1595_v35 = vld [vmem:[%s4273_s5] sm:$0xff] }
 0x25f   : > { %v1225_v43 = vpop.f32.mrb[4].mxu0  ;;  %v1302_v44 = vpop.f32.mrb[0].mxu1 }
 0x260   : > { %v2488_v45 = vadd.f32 %v2487_v15, %v1302_v44  ;;  %v1227_v46 = vpop.f32.mrb[5].mxu0  ;;  %v1304_v47 = vpop.f32.mrb[1].mxu1  ;;  %v2495_v61 = vadd.f32 %v1225_v43, %v1038_v48 }
 0x261   : > { %v2490_v12 = vadd.f32 %v2489_v40, %v1304_v47  ;;  %v2497_v63 = vadd.f32 %v1227_v46, %v1038_v48  ;;  %v1596_v40 = vld [vmem:[%s4273_s5 + $0x8] sm:$0xff] }
 0x262   : > { %v3494_v51 = vmax.f32 %v2488_v45, 0.0 }
 0x263   : > { %v1231_v53 = vpop.f32.mrb[6].mxu0  ;;  %v1308_v54 = vpop.f32.mrb[2].mxu1  ;;  %v3516_v21 = vmax.f32 %v2490_v12, 0.0 }
 0x264   : > { %v2492_v55 = vadd.f32 %v2491_v13, %v1308_v54  ;;  %v1310_v56 = vpop.f32.mrb[3].mxu1  ;;  %1333 = vrot.lane.b32.xlu1 %v3494_v51, %s2547_s19  ;;  %v1233_v57 = vpop.f32.mrb[7].mxu0  ;;  %v2499_v6 = vadd.f32 %v1231_v53, %v1043_v2 }
 0x265   : > { %v2494_v58 = vadd.f32 %v2493_v52, %v1310_v56  ;;  %v2501_v7 = vadd.f32 %v1233_v57, %v1043_v2 }
 0x266   : > { %v3498_v62 = vmax.f32 %v2492_v55, 0.0 }
 0x267   : > { %v1314_v16 = vpop.f32.mrb[4].mxu1  ;;  %v3522_v5 = vmax.f32 %v2494_v58, 0.0 }
 0x268   : > { %v2496_v17 = vadd.f32 %v2495_v61, %v1314_v16  ;;  %v1316_v0 = vpop.f32.mrb[5].mxu1  ;;  %1365 = vrot.lane.b32.xlu1 %v3494_v51, %s2548_s20  ;;  %1335 = vrot.lane.b32.xlu0 %v3498_v62, %s2547_s19 }
 0x269   : > { %v2498_v3 = vadd.f32 %v2497_v63, %v1316_v0 }
 0x26a   : > { %v3540_v10 = vmax.f32 %v2496_v17, 0.0 }
 0x26b   : > { %v1320_v23 = vpop.f32.mrb[6].mxu1  ;;  %v3564_v28 = vmax.f32 %v2498_v3, 0.0 }
 0x26c   : > { %v2500_v25 = vadd.f32 %v2499_v6, %v1320_v23  ;;  %v1322_v19 = vpop.f32.mrb[7].mxu1  ;;  %1397 = vrot.lane.b32.xlu1 %v3494_v51, %s2549_s21  ;;  %1367 = vrot.lane.b32.xlu0 %v3498_v62, %s2548_s20 }
 0x26d   : > { %v2502_v4 = vadd.f32 %v2501_v7, %v1322_v19 }
 0x26e   : > { %v3546_v11 = vmax.f32 %v2500_v25, 0.0 }
 0x26f   : > { %v3570_v30 = vmax.f32 %v2502_v4, 0.0 }
 0x270   : > { %1429 = vrot.lane.b32.xlu1 %v3494_v51, %s2550_s22  ;;  %1399 = vrot.lane.b32.xlu0 %v3498_v62, %s2549_s21 }
 0x274   : > { %1461 = vrot.lane.b32.xlu1 %v3494_v51, %s2551_s27  ;;  %1431 = vrot.lane.b32.xlu0 %v3498_v62, %s2550_s22 }
 0x278   : > { %1341 = vrot.lane.b32.xlu1 %v3516_v21, %s2547_s19  ;;  %1463 = vrot.lane.b32.xlu0 %v3498_v62, %s2551_s27 }
 0x27c   : > { %1373 = vrot.lane.b32.xlu1 %v3516_v21, %s2548_s20  ;;  %1343 = vrot.lane.b32.xlu0 %v3522_v5, %s2547_s19 }
 0x280   : > { %1405 = vrot.lane.b32.xlu1 %v3516_v21, %s2549_s21  ;;  %1375 = vrot.lane.b32.xlu0 %v3522_v5, %s2548_s20 }
 0x284   : > { %1437 = vrot.lane.b32.xlu1 %v3516_v21, %s2550_s22  ;;  %1407 = vrot.lane.b32.xlu0 %v3522_v5, %s2549_s21 }
 0x288   : > { %1469 = vrot.lane.b32.xlu1 %v3516_v21, %s2551_s27  ;;  %1439 = vrot.lane.b32.xlu0 %v3522_v5, %s2550_s22 }
 0x28c   : > { %1471 = vrot.lane.b32.xlu0 %v3522_v5, %s2551_s27  ;;  %1337 = vrot.lane.b32.xlu1 %v3540_v10, %s2547_s19 }
 0x290   : > { %1369 = vrot.lane.b32.xlu1 %v3540_v10, %s2548_s20  ;;  %1339 = vrot.lane.b32.xlu0 %v3546_v11, %s2547_s19 }
 0x294   : > { %1401 = vrot.lane.b32.xlu1 %v3540_v10, %s2549_s21  ;;  %1371 = vrot.lane.b32.xlu0 %v3546_v11, %s2548_s20 }
 0x298   : > { %1433 = vrot.lane.b32.xlu1 %v3540_v10, %s2550_s22  ;;  %1403 = vrot.lane.b32.xlu0 %v3546_v11, %s2549_s21 }
 0x29c   : > { %1465 = vrot.lane.b32.xlu1 %v3540_v10, %s2551_s27  ;;  %1435 = vrot.lane.b32.xlu0 %v3546_v11, %s2550_s22 }
 0x2a0   : > { %1345 = vrot.lane.b32.xlu1 %v3564_v28, %s2547_s19  ;;  %1467 = vrot.lane.b32.xlu0 %v3546_v11, %s2551_s27 }
 0x2a4   : > { %1493 = vrot.lane.b32.xlu1 %v3494_v51, %s2552_s30  ;;  %1347 = vrot.lane.b32.xlu0 %v3570_v30, %s2547_s19 }
 0x2a8   : > { %1377 = vrot.lane.b32.xlu1 %v3564_v28, %s2548_s20  ;;  %1495 = vrot.lane.b32.xlu0 %v3498_v62, %s2552_s30 }
 0x2ac   : > { %1409 = vrot.lane.b32.xlu1 %v3564_v28, %s2549_s21  ;;  %1379 = vrot.lane.b32.xlu0 %v3570_v30, %s2548_s20 }
 0x2b0   : > { %1441 = vrot.lane.b32.xlu1 %v3564_v28, %s2550_s22  ;;  %1503 = vrot.lane.b32.xlu0 %v3522_v5, %s2552_s30 }
 0x2b4   : > { %1473 = vrot.lane.b32.xlu1 %v3564_v28, %s2551_s27  ;;  %1411 = vrot.lane.b32.xlu0 %v3570_v30, %s2549_s21 }
 0x2b8   : > { %1501 = vrot.lane.b32.xlu1 %v3516_v21, %s2552_s30  ;;  %1499 = vrot.lane.b32.xlu0 %v3546_v11, %s2552_s30 }
 0x2bc   : > { %1497 = vrot.lane.b32.xlu1 %v3540_v10, %s2552_s30  ;;  %1443 = vrot.lane.b32.xlu0 %v3570_v30, %s2550_s22 }
 0x2c0   : > { %1505 = vrot.lane.b32.xlu1 %v3564_v28, %s2552_s30  ;;  %1527 = vrot.lane.b32.xlu0 %v3498_v62, %s2553_s15 }
 0x2c4   : > { %1525 = vrot.lane.b32.xlu1 %v3494_v51, %s2553_s15  ;;  %1535 = vrot.lane.b32.xlu0 %v3522_v5, %s2553_s15 }
 0x2c8   : > { %1533 = vrot.lane.b32.xlu1 %v3516_v21, %s2553_s15  ;;  %1531 = vrot.lane.b32.xlu0 %v3546_v11, %s2553_s15 }
 0x2cc   : > { %1529 = vrot.lane.b32.xlu1 %v3540_v10, %s2553_s15  ;;  %1475 = vrot.lane.b32.xlu0 %v3570_v30, %s2551_s27 }
 0x2d0   : > { %1537 = vrot.lane.b32.xlu1 %v3564_v28, %s2553_s15  ;;  %1559 = vrot.lane.b32.xlu0 %v3498_v62, %s2554_s16 }
 0x2d4   : > { %1557 = vrot.lane.b32.xlu1 %v3494_v51, %s2554_s16  ;;  %1507 = vrot.lane.b32.xlu0 %v3570_v30, %s2552_s30 }
 0x2d6   : > { %v1334_v31 = vpop.permute.xlu1 %1333 }
 0x2d8   : > { %1565 = vrot.lane.b32.xlu1 %v3516_v21, %s2554_s16  ;;  %1567 = vrot.lane.b32.xlu0 %v3522_v5, %s2554_s16 }
 0x2da   : > { %v3631_v8 = vpop.permute.xlu1 %1365  ;;  %v1336_v9 = vpop.permute.xlu0 %1335 }
 0x2dc   : > { %1561 = vrot.lane.b32.xlu1 %v3540_v10, %s2554_s16  ;;  %1539 = vrot.lane.b32.xlu0 %v3570_v30, %s2553_s15 }
 0x2de   : > { %v3637_v33 = vpop.permute.xlu1 %1397  ;;  %v1368_v34 = vpop.permute.xlu0 %1367 }
 0x2e0   : > { %1569 = vrot.lane.b32.xlu1 %v3564_v28, %s2554_s16  ;;  %1563 = vrot.lane.b32.xlu0 %v3546_v11, %s2554_s16 }
 0x2e2   : > { %v3646_v14 = vpop.permute.xlu1 %1429  ;;  %v3648_v15 = vpop.permute.xlu0 %1399 }
 0x2e4   : > { %1599 = vperm.xlu1 %2538, %v1595_v35   ;;  %1571 = vrot.lane.b32.xlu0 %v3570_v30, %s2554_s16 }
 0x2e6   : > { %v3655_v43 = vpop.permute.xlu1 %1461  ;;  %v3657_v44 = vpop.permute.xlu0 %1431 }
 0x2e8   : > { %1604 = vperm.xlu0 %2537, %v1596_v40  }
 0x2ea   : > { %v1342_v45 = vpop.permute.xlu1 %1341  ;;  %v3659_v46 = vpop.permute.xlu0 %1463 }
 0x2eb   : > { %v1349_v47 = vsel %vm425_vm0, %v1334_v31, %v1342_v45  ;;  %v1353_v12 = vsel %vm425_vm0, %v1342_v45, %v1334_v31 }
 0x2ec   : > { %v1357_v54 = vmul.f32 %v1353_v12, %v2812_v26  ;;  %v1358_v55 = vmul.f32 %v1349_v47, %v2803_v24 }
 0x2ee   : > { %v1374_v13 = vpop.permute.xlu1 %1373  ;;  %v1344_v48 = vpop.permute.xlu0 %1343 }
 0x2ef   : > { %v1350_v52 = vsel %vm425_vm0, %v1336_v9, %v1344_v48  ;;  %v1354_v53 = vsel %vm425_vm0, %v1344_v48, %v1336_v9 }
 0x2f0   : > { %v1359_v56 = vmul.f32 %v1354_v53, %v2812_v26  ;;  %v1360_v57 = vmul.f32 %v1350_v52, %v2803_v24  ;;  %v1381_v52 = vsel %vm501_vm1, %v3631_v8, %v1374_v13 }
 0x2f2   : > { %v2365_v58 = vpack.c.bf16 %v1359_v56, %v1357_v54  ;;  %v3673_v61 = vpop.permute.xlu1 %1405  ;;  %v1376_v63 = vpop.permute.xlu0 %1375  ;;  %v2363_v16 = vpack.c.bf16 %v1360_v57, %v1358_v55 }
 0x2f3   : > { %v1382_v47 = vsel %vm501_vm1, %v1368_v34, %v1376_v63  ;;  %v1386_v55 = vsel %vm501_vm1, %v1376_v63, %v1368_v34  ;;  %v1385_v34 = vsel %vm501_vm1, %v1374_v13, %v3631_v8  ;;  %v1390_v63 = vmul.f32 %v1381_v52, %v2901_v42 }
 0x2f4   : > { %2364 = vmatprep.subr.bf16.mxu1 %v2363_v16  ;;  %v1392_v56 = vmul.f32 %v1382_v47, %v2901_v42  ;;  %v1391_v47 = vmul.f32 %v1386_v55, %v2898_v41 }
 0x2f5   : > { %2366 = vmatpush1.bf16.msra.mxu1 %v2365_v58 }
 0x2f6   : > { %v3675_v17 = vpop.permute.xlu1 %1437  ;;  %v1408_v0 = vpop.permute.xlu0 %1407 }
 0x2fa   : > { %v3677_v2 = vpop.permute.xlu1 %1469  ;;  %v3679_v3 = vpop.permute.xlu0 %1439 }
 0x2fe   : > { %v3681_v6 = vpop.permute.xlu0 %1471  ;;  %v1338_v7 = vpop.permute.xlu1 %1337 }
 0x302   : > { %v1370_v23 = vpop.permute.xlu1 %1369  ;;  %v1340_v25 = vpop.permute.xlu0 %1339 }
 0x306   : > { %v3683_v19 = vpop.permute.xlu1 %1401  ;;  %v1372_v4 = vpop.permute.xlu0 %1371 }
 0x30a   : > { %v3685_v31 = vpop.permute.xlu1 %1433  ;;  %v3687_v32 = vpop.permute.xlu0 %1403 }
 0x30e   : > { %v3689_v9 = vpop.permute.xlu1 %1465  ;;  %v3691_v35 = vpop.permute.xlu0 %1435 }
 0x312   : > { %v1346_v40 = vpop.permute.xlu1 %1345  ;;  %v3693_v45 = vpop.permute.xlu0 %1467 }
 0x313   : > { %v1351_v12 = vsel %vm425_vm0, %v1338_v7, %v1346_v40  ;;  %v1355_v48 = vsel %vm425_vm0, %v1346_v40, %v1338_v7 }
 0x314   : > { %v1361_v16 = vmul.f32 %v1355_v48, %v2812_v26  ;;  %v1362_v7 = vmul.f32 %v1351_v12, %v2803_v24  ;;  %v1389_v48 = vmul.f32 %v1385_v34, %v2898_v41  ;;  %v1414_v12 = vsel %vm577_vm2, %v3648_v15, %v1408_v0 }
 0x316   : > { %v3704_v53 = vpop.permute.xlu1 %1493  ;;  %v1348_v54 = vpop.permute.xlu0 %1347  ;;  %v2373_v52 = vpack.c.bf16 %v1391_v47, %v1389_v48 }
 0x317   : > { %v1352_v57 = vsel %vm425_vm0, %v1340_v25, %v1348_v54  ;;  %v1356_v58 = vsel %vm425_vm0, %v1348_v54, %v1340_v25  ;;  %v2371_v54 = vpack.c.bf16 %v1392_v56, %v1390_v63  ;;  %v1418_v56 = vsel %vm577_vm2, %v1408_v0, %v3648_v15 }
 0x318   : > { %v1363_v40 = vmul.f32 %v1356_v58, %v2812_v26  ;;  %v1364_v20 = vmul.f32 %v1352_v57, %v2803_v24  ;;  %v1424_v58 = vmul.f32 %v1414_v12, %v2991_v60  ;;  %v1417_v15 = vsel %vm577_vm2, %v3673_v61, %v3637_v33 }
 0x319   : > { %v1423_v34 = vmul.f32 %v1418_v56, %v2988_v59  ;;  %v1421_v48 = vmul.f32 %v1417_v15, %v2988_v59  ;;  %v1446_v12 = vsel %vm653_vm3, %v3657_v44, %v3679_v3 }
 0x31a   : > { %v2369_v1 = vpack.c.bf16 %v1363_v40, %v1361_v16  ;;  %v1378_v22 = vpop.permute.xlu1 %1377  ;;  %v3722_v49 = vpop.permute.xlu0 %1495  ;;  %v2367_v25 = vpack.c.bf16 %v1364_v20, %v1362_v7  ;;  %v1413_v20 = vsel %vm577_vm2, %v3637_v33, %v3673_v61  ;;  %v1456_v56 = vmul.f32 %v1446_v12, %v3081_v37 }
 0x31b   : > { %v1383_v8 = vsel %vm501_vm1, %v1370_v23, %v1378_v22  ;;  %v1387_v13 = vsel %vm501_vm1, %v1378_v22, %v1370_v23  ;;  %v1422_v0 = vmul.f32 %v1413_v20, %v2991_v60 }
 0x31c   : > { %2368 = vmatprep.subr.bf16.mxu1 %v2367_v25  ;;  %v1394_v23 = vmul.f32 %v1383_v8, %v2901_v42  ;;  %v1445_v8 = vsel %vm653_vm3, %v3646_v14, %v3675_v17 }
 0x31d   : > { %2370 = vmatpush1.bf16.msra.mxu1 %v2369_v1  ;;  %v1393_v1 = vmul.f32 %v1387_v13, %v2898_v41  ;;  %v2381_v13 = vpack.c.bf16 %v1423_v34, %v1421_v48 }
 0x31e   : > { %v1410_v55 = vpop.permute.xlu1 %1409  ;;  %2372 = vmatprep.subr.bf16.mxu1 %v2371_v54  ;;  %v1380_v57 = vpop.permute.xlu0 %1379  ;;  %v2379_v54 = vpack.c.bf16 %v1424_v58, %v1422_v0 }
 0x31f   : > { %v1384_v16 = vsel %vm501_vm1, %v1372_v4, %v1380_v57  ;;  %v1388_v22 = vsel %vm501_vm1, %v1380_v57, %v1372_v4  ;;  %v1415_v33 = vsel %vm577_vm2, %v3683_v19, %v1410_v55  ;;  %v1419_v61 = vsel %vm577_vm2, %v1410_v55, %v3683_v19 }
 0x320   : > { %v1395_v7 = vmul.f32 %v1388_v22, %v2898_v41  ;;  %v1396_v40 = vmul.f32 %v1384_v16, %v2901_v42  ;;  %v1450_v57 = vsel %vm653_vm3, %v3679_v3, %v3657_v44  ;;  %v1425_v58 = vmul.f32 %v1419_v61, %v2988_v59 }
 0x321   : > { %2374 = vmatpush1.bf16.msra.mxu1 %v2373_v52  ;;  %v1426_v16 = vmul.f32 %v1415_v33, %v2991_v60  ;;  %v1449_v44 = vsel %vm653_vm3, %v3675_v17, %v3646_v14  ;;  %v1454_v3 = vmul.f32 %v1445_v8, %v3081_v37  ;;  %v1455_v15 = vmul.f32 %v1450_v57, %v3078_v36 }
 0x322   : > { %v2377_v63 = vpack.c.bf16 %v1395_v7, %v1393_v1  ;;  %v1442_v4 = vpop.permute.xlu1 %1441  ;;  %v3754_v47 = vpop.permute.xlu0 %1503  ;;  %v2375_v25 = vpack.c.bf16 %v1396_v40, %v1394_v23  ;;  %v1453_v34 = vmul.f32 %v1449_v44, %v3078_v36 }
 0x323   : > { %v2387_v0 = vpack.c.bf16 %v1456_v56, %v1454_v3  ;;  %v1451_v14 = vsel %vm653_vm3, %v1442_v4, %v3685_v31  ;;  %v2395_v56 = vpack.c.bf16 %v3522_v5, %v3516_v21  ;;  %v2397_v21 = vpack.c.bf16 %v3498_v62, %v3494_v51 }
 0x324   : > { %2376 = vmatprep.subr.bf16.mxu1 %v2375_v25  ;;  %v2389_v48 = vpack.c.bf16 %v1455_v15, %v1453_v34  ;;  %v1457_v33 = vmul.f32 %v1451_v14, %v3078_v36  ;;  %v2401_v51 = vpack.c.bf16 %v3546_v11, %v3540_v10  ;;  %v1514_v10 = vsel %vm805_vm5, %v3754_v47, %v3722_v49 }
 0x325   : > { %2378 = vmatpush1.bf16.msra.mxu1 %v2377_v63  ;;  %v1447_v63 = vsel %vm653_vm3, %v3685_v31, %v1442_v4 }
 0x326   : > { %v3771_v20 = vpop.permute.xlu1 %1473  ;;  %2380 = vmatprep.subr.bf16.mxu1 %v2379_v54  ;;  %v1412_v52 = vpop.permute.xlu0 %1411  ;;  %v1458_v61 = vmul.f32 %v1447_v63, %v3081_v37 }
 0x327   : > { %v1416_v19 = vsel %vm577_vm2, %v3687_v32, %v1412_v52  ;;  %v1420_v55 = vsel %vm577_vm2, %v1412_v52, %v3687_v32 }
 0x328   : > { %v1427_v22 = vmul.f32 %v1420_v55, %v2988_v59  ;;  %v1428_v1 = vmul.f32 %v1416_v19, %v2991_v60 }
 0x329   : > { %2382 = vmatpush1.bf16.msra.mxu1 %v2381_v13 }
 0x32a   : > { %v2385_v23 = vpack.c.bf16 %v1427_v22, %v1425_v58  ;;  %v1502_v7 = vpop.permute.xlu1 %1501  ;;  %v3793_v40 = vpop.permute.xlu0 %1499  ;;  %v2383_v32 = vpack.c.bf16 %v1428_v1, %v1426_v16  ;;  %v1481_v58 = vsel %vm729_vm4, %v3677_v2, %v3655_v43  ;;  %v1478_v16 = vsel %vm729_vm4, %v3659_v46, %v3681_v6 }
 0x32b   : > { %v2399_v22 = vpack.c.bf16 %v3570_v30, %v3564_v28  ;;  %v1477_v1 = vsel %vm729_vm4, %v3655_v43, %v3677_v2  ;;  %v1486_v44 = vmul.f32 %v1481_v58, %v3197_v27  ;;  %v1487_v3 = vmul.f32 %v1478_v16, %v3213_v29 }
 0x32c   : > { %2384 = vmatprep.subr.bf16.mxu1 %v2383_v32  ;;  %v1485_v62 = vmul.f32 %v1477_v1, %v3213_v29  ;;  %v1479_v28 = vsel %vm729_vm4, %v3689_v9, %v3771_v20  ;;  %v1483_v43 = vsel %vm729_vm4, %v3771_v20, %v3689_v9  ;;  %v1513_v2 = vsel %vm805_vm5, %v1502_v7, %v3704_v53 }
 0x32d   : > { %2386 = vmatpush1.bf16.msra.mxu1 %v2385_v23  ;;  %v1489_v15 = vmul.f32 %v1479_v28, %v3213_v29  ;;  %v1509_v9 = vsel %vm805_vm5, %v3704_v53, %v1502_v7  ;;  %v1490_v34 = vmul.f32 %v1483_v43, %v3197_v27  ;;  %v1518_v63 = vmul.f32 %v1513_v2, %v3292_v39 }
 0x32e   : > { %v3803_v17 = vpop.permute.xlu1 %1497  ;;  %2388 = vmatprep.subr.bf16.mxu1 %v2387_v0  ;;  %v1444_v25 = vpop.permute.xlu0 %1443  ;;  %v1510_v53 = vsel %vm805_vm5, %v3722_v49, %v3754_v47  ;;  %v1520_v7 = vmul.f32 %v1514_v10, %v3292_v39 }
 0x32f   : > { %v1448_v12 = vsel %vm653_vm3, %v3691_v35, %v1444_v25  ;;  %v1452_v54 = vsel %vm653_vm3, %v1444_v25, %v3691_v35  ;;  %v1482_v35 = vsel %vm729_vm4, %v3681_v6, %v3659_v46  ;;  %v2405_v6 = vpack.c.bf16 %v1487_v3, %v1485_v62  ;;  %v4290_v3 = vld [vmem:[#allocation2_spill] sm:$0xff] }
 0x330   : > { %v1459_v31 = vmul.f32 %v1452_v54, %v3078_v36  ;;  %v1460_v4 = vmul.f32 %v1448_v12, %v3081_v37  ;;  %v1488_v5 = vmul.f32 %v1482_v35, %v3197_v27 }
 0x331   : > { %2390 = vmatpush1.bf16.msra.mxu1 %v2389_v48  ;;  %v1517_v48 = vmul.f32 %v1509_v9, %v3289_v38 }
 0x332   : > { %v2393_v8 = vpack.c.bf16 %v1459_v31, %v1457_v33  ;;  %v1506_v13 = vpop.permute.xlu1 %1505  ;;  %v3815_v52 = vpop.permute.xlu0 %1527  ;;  %v2391_v57 = vpack.c.bf16 %v1460_v4, %v1458_v61  ;;  %v2403_v30 = vpack.c.bf16 %v1488_v5, %v1486_v44  ;;  %v1519_v31 = vmul.f32 %v1510_v53, %v3289_v38 }
 0x333   : > { %v1511_v61 = vsel %vm805_vm5, %v3803_v17, %v1506_v13  ;;  %v2411_v4 = vpack.c.bf16 %v1520_v7, %v1518_v63  ;;  %v1515_v49 = vsel %vm805_vm5, %v1506_v13, %v3803_v17 }
 0x334   : > { %2392 = vmatprep.subr.bf16.mxu1 %v2391_v57  ;;  %v1521_v57 = vmul.f32 %v1511_v61, %v3289_v38  ;;  %v4292_v61 = vld [vmem:[#allocation4_spill] sm:$0xff] }
 0x335   : > { %2394 = vmatpush1.bf16.msra.mxu1 %v2393_v8  ;;  %v2413_v8 = vpack.c.bf16 %v1519_v31, %v1517_v48 }
 0x336   : > { %v1526_v19 = vpop.permute.xlu1 %1525  ;;  %2396 = vmatprep.subr.bf16.mxu1 %v2395_v56  ;;  %v1536_v55 = vpop.permute.xlu0 %1535 }
 0x337   : > { %v1546_v58 = vsel %vm881_vm6, %v1536_v55, %v3815_v52 }
 0x338   : > { %v1552_v44 = vmul.f32 %v1546_v58, %v3350_v50 }
 0x339   : > { %2398 = vmatpush1.bf16.msra.mxu1 %v2397_v21  ;;  %v1522_v21 = vmul.f32 %v1515_v49, %v3292_v39 }
 0x33a   : > { %v1534_v23 = vpop.permute.xlu1 %1533  ;;  %v3842_v46 = vpop.permute.xlu0 %1531  ;;  %2400 = vmatprep.subr.bf16.mxu1 %v2399_v22 }
 0x33b   : > { %v1545_v47 = vsel %vm881_vm6, %v1534_v23, %v1526_v19  ;;  %v1541_v16 = vsel %vm881_vm6, %v1526_v19, %v1534_v23  ;;  %v1542_v19 = vsel %vm881_vm6, %v3815_v52, %v1536_v55 }
 0x33c   : > { %v1550_v5 = vmul.f32 %v1545_v47, %v3350_v50  ;;  %v1549_v23 = vmul.f32 %v1541_v16, %v4290_v3  ;;  %v1551_v2 = vmul.f32 %v1542_v19, %v4290_v3 }
 0x33d   : > { %2402 = vmatpush1.bf16.msra.mxu1 %v2401_v51 }
 0x33e   : > { %v1530_v11 = vpop.permute.xlu1 %1529  ;;  %v1476_v32 = vpop.permute.xlu0 %1475  ;;  %2404 = vmatprep.subr.bf16.mxu1 %v2403_v30  ;;  %v2421_v10 = vpack.c.bf16 %v1551_v2, %v1549_v23  ;;  %v1591_v23 = vld [vmem:[%s4272_s4 + $0x10] sm:$0xff] }
 0x33f   : > { %v1480_v20 = vsel %vm729_vm4, %v3693_v45, %v1476_v32  ;;  %v1484_v0 = vsel %vm729_vm4, %v1476_v32, %v3693_v45 }
 0x340   : > { %v1491_v14 = vmul.f32 %v1480_v20, %v3213_v29  ;;  %v1492_v25 = vmul.f32 %v1484_v0, %v3197_v27 }
 0x341   : > { %2406 = vmatpush1.bf16.msra.mxu1 %v2405_v6  ;;  %v2419_v6 = vpack.c.bf16 %v1552_v44, %v1550_v5  ;;  %v4293_v44 = vmov 0.0  }
 0x342   : > { %v2409_v12 = vpack.c.bf16 %v1491_v14, %v1489_v15  ;;  %v1538_v45 = vpop.permute.xlu1 %1537  ;;  %v1560_v54 = vpop.permute.xlu0 %1559  ;;  %v2407_v33 = vpack.c.bf16 %v1492_v25, %v1490_v34  ;;  %v4291_v14 = vld [vmem:[#allocation3_spill] sm:$0xff] }
 0x343   : > { %v1543_v30 = vsel %vm881_vm6, %v1530_v11, %v1538_v45  ;;  %v1547_v43 = vsel %vm881_vm6, %v1538_v45, %v1530_v11 }
 0x344   : > { %2408 = vmatprep.subr.bf16.mxu1 %v2407_v33  ;;  %v1553_v32 = vmul.f32 %v1543_v30, %v4290_v3  ;;  %v1554_v15 = vmul.f32 %v1547_v43, %v3350_v50 }
 0x345   : > { %2410 = vmatpush1.bf16.msra.mxu1 %v2409_v12 }
 0x346   : > { %v1558_v56 = vpop.permute.xlu1 %1557  ;;  %v1508_v35 = vpop.permute.xlu0 %1507  ;;  %2412 = vmatprep.subr.bf16.mxu1 %v2411_v4 }
 0x347   : > { %v1512_v17 = vsel %vm805_vm5, %v3793_v40, %v1508_v35  ;;  %v1516_v13 = vsel %vm805_vm5, %v1508_v35, %v3793_v40 }
 0x348   : > { %v1523_v22 = vmul.f32 %v1512_v17, %v3289_v38  ;;  %v1524_v1 = vmul.f32 %v1516_v13, %v3292_v39 }
 0x349   : > { %2414 = vmatpush1.bf16.msra.mxu1 %v2413_v8  ;;  %v1589_v8 = vld [vmem:[%s4272_s4] sm:$0xff] }
 0x34a   : > { %v2417_v51 = vpack.c.bf16 %v1523_v22, %v1521_v57  ;;  %v1566_v62 = vpop.permute.xlu1 %1565  ;;  %v1568_v40 = vpop.permute.xlu0 %1567  ;;  %v2415_v28 = vpack.c.bf16 %v1524_v1, %v1522_v21  ;;  %v1592_v22 = vld [vmem:[%s4272_s4 + $0x18] sm:$0xff] }
 0x34b   : > { %v1577_v52 = vsel %vm957_vm7, %v1566_v62, %v1558_v56  ;;  %v1578_v55 = vsel %vm957_vm7, %v1568_v40, %v1560_v54  ;;  %v1573_v11 = vsel %vm957_vm7, %v1558_v56, %v1566_v62  ;;  %v1574_v0 = vsel %vm957_vm7, %v1560_v54, %v1568_v40  ;;  %v1593_v56 = vld [vmem:[%s4272_s4 + $0x20] sm:$0xff] }
 0x34c   : > { %2416 = vmatprep.subr.bf16.mxu1 %v2415_v28  ;;  %v1582_v25 = vmul.f32 %v1577_v52, %v4291_v14  ;;  %v1584_v53 = vmul.f32 %v1578_v55, %v4291_v14  ;;  %v1581_v31 = vmul.f32 %v1573_v11, %v4292_v61  ;;  %v1583_v4 = vmul.f32 %v1574_v0, %v4292_v61 }
 0x34d   : > { %2418 = vmatpush1.bf16.msra.mxu1 %v2417_v51  ;;  %v1594_v51 = vld [vmem:[%s4272_s4 + $0x28] sm:$0xff] }
 0x34e   : > { %v1562_v9 = vpop.permute.xlu1 %1561  ;;  %v1540_v20 = vpop.permute.xlu0 %1539  ;;  %2420 = vmatprep.subr.bf16.mxu1 %v2419_v6  ;;  %v2427_v49 = vpack.c.bf16 %v1584_v53, %v1582_v25  ;;  %v2429_v35 = vpack.c.bf16 %v1583_v4, %v1581_v31 }
 0x34f   : > { %v1544_v34 = vsel %vm881_vm6, %v3842_v46, %v1540_v20  ;;  %v1548_v63 = vsel %vm881_vm6, %v1540_v20, %v3842_v46 }
 0x350   : > { %v1555_v7 = vmul.f32 %v1544_v34, %v4290_v3  ;;  %v1556_v48 = vmul.f32 %v1548_v63, %v3350_v50  ;;  %v1901_v34 = vld [vmem:[%s4274_s6 + $0x8] sm:$0xff]  ;;  %v1902_v63 = vld [vmem:[%s4275_s7] sm:$0xff] }
 0x351   : > { %2422 = vmatpush1.bf16.msra.mxu1 %v2421_v10 }
 0x352   : > { %v2425_v12 = vpack.c.bf16 %v1555_v7, %v1553_v32  ;;  %v1570_v45 = vpop.permute.xlu1 %1569  ;;  %v1564_v54 = vpop.permute.xlu0 %1563  ;;  %v2423_v33 = vpack.c.bf16 %v1556_v48, %v1554_v15 }
 0x353   : > { %v1575_v46 = vsel %vm957_vm7, %v1562_v9, %v1570_v45  ;;  %v1579_v47 = vsel %vm957_vm7, %v1570_v45, %v1562_v9 }
 0x354   : > { %2424 = vmatprep.subr.bf16.mxu1 %v2423_v33  ;;  %v1585_v17 = vmul.f32 %v1575_v46, %v4292_v61  ;;  %v1586_v13 = vmul.f32 %v1579_v47, %v4291_v14 }
 0x355   : > { %2426 = vmatpush1.bf16.msra.mxu1 %v2425_v12 }
 0x356   : > { %v1572_v57 = vpop.permute.xlu0 %1571  ;;  %2428 = vmatprep.subr.bf16.mxu1 %v2427_v49 }
 0x357   : > { %v1576_v58 = vsel %vm957_vm7, %v1564_v54, %v1572_v57  ;;  %v1580_v16 = vsel %vm957_vm7, %v1572_v57, %v1564_v54 }
 0x358   : > { %v1587_v21 = vmul.f32 %v1576_v58, %v4292_v61  ;;  %v1588_v5 = vmul.f32 %v1580_v16, %v4291_v14  ;;  %1679 = vmatmul.mubr.f32.vlgmr.msra.gmra.mrb[8].mxu1 %v1589_v8 }
 0x359   : > { %2430 = vmatpush1.bf16.msra.mxu1 %v2429_v35  ;;  %1684 = vmatprep.mubr.f32.mxu1 %v1593_v56 }
 0x35a   : > { %v2433_v1 = vpack.c.bf16 %v1587_v21, %v1585_v17  ;;  %v2431_v19 = vpack.c.bf16 %v1588_v5, %v1586_v13 }
 0x35c   : > { %1685 = vmatmul.mubr.f32.gmra.mrb[10].mxu1 %v1592_v22  ;;  %2432 = vmatprep.subr.bf16.mxu1 %v2431_v19 }
 0x35d   : > { %2434 = vmatpush1.bf16.msra.mxu1 %v2433_v1  ;;  %1755 = vmatprep.mubr.f32.mxu1 %v4293_v44 }
 0x360   : > { %2211 = vmatmul.mubr.msk.f32.vlgmr.msra.gmra.mrb[8].mxu1 %vm1607_vm9, %v1591_v23 }
 0x361   : > { %1761 = vmatprep.mubr.f32.mxu1 %v4293_v44 }
 0x363   : > { %v1600_v62 = vpop.permute.xlu1 %1599 }
 0x364   : > { %2212 = vmatmul.mubr.msk.f32.gmra.mrb[10].mxu1 %vm1607_vm9, %v1594_v51 }
 0x365   : > { %2213 = vmatprep.mubr.msk.f32.mxu1 %vm1908_vm10, %v1901_v34 }
 0x367   : > { %v1605_v2 = vpop.permute.xlu0 %1604 }
 0x433   : > { %v1757_v40 = vpop.f32.mrb[8].mxu1 }
 0x434   : > { %v2503_v28 = vadd.f32 %v1757_v40, %v1600_v62  ;;  %v1759_v30 = vpop.f32.mrb[9].mxu1 }
 0x435   : > { %v2504_v6 = vadd.f32 %v1759_v30, %v1600_v62 }
 0x436   : > { %v3968_v43 = vmax.f32 %v2503_v28, 0.0 }
 0x437   : > { %v1763_v52 = vpop.f32.mrb[10].mxu1  ;;  %v3974_v9 = vmax.f32 %v2504_v6, 0.0 }
 0x438   : > { %v2505_v55 = vadd.f32 %v1763_v52, %v1605_v2  ;;  %v1765_v10 = vpop.f32.mrb[11].mxu1  ;;  %1772 = vrot.lane.b32.xlu1 %v3968_v43, %s2547_s19 }
 0x439   : > { %v2506_v32 = vadd.f32 %v1765_v10, %v1605_v2 }
 0x43a   : > { %v3972_v15 = vmax.f32 %v2505_v55, 0.0 }
 0x43b   : > { %v3976_v20 = vmax.f32 %v2506_v32, 0.0 }
 0x43c   : > { %1774 = vrot.lane.b32.xlu0 %v3972_v15, %s2547_s19  ;;  %1788 = vrot.lane.b32.xlu1 %v3968_v43, %s2548_s20  ;;  %v2453_v11 = vpack.c.bf16 %v3972_v15, %v3968_v43 }
 0x43d   : > { %v2451_v0 = vpack.c.bf16 %v3976_v20, %v3974_v9 }
 0x440   : > { %1790 = vrot.lane.b32.xlu0 %v3972_v15, %s2548_s20  ;;  %1804 = vrot.lane.b32.xlu1 %v3968_v43, %s2549_s21 }
 0x444   : > { %1806 = vrot.lane.b32.xlu0 %v3972_v15, %s2549_s21  ;;  %1820 = vrot.lane.b32.xlu1 %v3968_v43, %s2550_s22 }
 0x448   : > { %1822 = vrot.lane.b32.xlu0 %v3972_v15, %s2550_s22  ;;  %1836 = vrot.lane.b32.xlu1 %v3968_v43, %s2551_s27 }
 0x44c   : > { %1838 = vrot.lane.b32.xlu0 %v3972_v15, %s2551_s27  ;;  %1852 = vrot.lane.b32.xlu1 %v3968_v43, %s2552_s30 }
 0x450   : > { %1854 = vrot.lane.b32.xlu0 %v3972_v15, %s2552_s30  ;;  %1868 = vrot.lane.b32.xlu1 %v3968_v43, %s2553_s15 }
 0x454   : > { %1870 = vrot.lane.b32.xlu0 %v3972_v15, %s2553_s15  ;;  %1776 = vrot.lane.b32.xlu1 %v3974_v9, %s2547_s19 }
 0x458   : > { %1778 = vrot.lane.b32.xlu0 %v3976_v20, %s2547_s19  ;;  %1792 = vrot.lane.b32.xlu1 %v3974_v9, %s2548_s20 }
 0x45c   : > { %1794 = vrot.lane.b32.xlu0 %v3976_v20, %s2548_s20  ;;  %1808 = vrot.lane.b32.xlu1 %v3974_v9, %s2549_s21 }
 0x460   : > { %1810 = vrot.lane.b32.xlu0 %v3976_v20, %s2549_s21  ;;  %1824 = vrot.lane.b32.xlu1 %v3974_v9, %s2550_s22 }
 0x464   : > { %1826 = vrot.lane.b32.xlu0 %v3976_v20, %s2550_s22  ;;  %1884 = vrot.lane.b32.xlu1 %v3968_v43, %s2554_s16 }
 0x468   : > { %1886 = vrot.lane.b32.xlu0 %v3972_v15, %s2554_s16  ;;  %1840 = vrot.lane.b32.xlu1 %v3974_v9, %s2551_s27 }
 0x46c   : > { %1842 = vrot.lane.b32.xlu0 %v3976_v20, %s2551_s27  ;;  %1856 = vrot.lane.b32.xlu1 %v3974_v9, %s2552_s30 }
 0x470   : > { %1858 = vrot.lane.b32.xlu0 %v3976_v20, %s2552_s30  ;;  %1872 = vrot.lane.b32.xlu1 %v3974_v9, %s2553_s15 }
 0x474   : > { %1874 = vrot.lane.b32.xlu0 %v3976_v20, %s2553_s15  ;;  %1888 = vrot.lane.b32.xlu1 %v3974_v9, %s2554_s16 }
 0x478   : > { %1890 = vrot.lane.b32.xlu0 %v3976_v20, %s2554_s16  ;;  %1905 = vperm.xlu1 %2538, %v1902_v63  }
 0x4aa   : > { %v1773_v25 = vpop.permute.xlu1 %1772 }
 0x4ae   : > { %v1775_v53 = vpop.permute.xlu0 %1774  ;;  %v1789_v7 = vpop.permute.xlu1 %1788 }
 0x4b2   : > { %v1791_v48 = vpop.permute.xlu0 %1790  ;;  %v1805_v12 = vpop.permute.xlu1 %1804 }
 0x4b6   : > { %v1807_v45 = vpop.permute.xlu0 %1806  ;;  %v1821_v54 = vpop.permute.xlu1 %1820 }
 0x4ba   : > { %v1823_v33 = vpop.permute.xlu0 %1822  ;;  %v4050_v31 = vpop.permute.xlu1 %1836 }
 0x4be   : > { %v4052_v4 = vpop.permute.xlu0 %1838  ;;  %v4054_v49 = vpop.permute.xlu1 %1852 }
 0x4c2   : > { %v4056_v46 = vpop.permute.xlu0 %1854  ;;  %v4058_v47 = vpop.permute.xlu1 %1868 }
 0x4c6   : > { %v4060_v8 = vpop.permute.xlu0 %1870  ;;  %v1777_v57 = vpop.permute.xlu1 %1776 }
 0x4c7   : > { %v1780_v56 = vsel %vm425_vm0, %v1773_v25, %v1777_v57  ;;  %v1782_v35 = vsel %vm425_vm0, %v1777_v57, %v1773_v25 }
 0x4c8   : > { %v1784_v21 = vmul.f32 %v1782_v35, %v2812_v26  ;;  %v1785_v5 = vmul.f32 %v1780_v56, %v2803_v24 }
 0x4ca   : > { %v1779_v58 = vpop.permute.xlu0 %1778  ;;  %v1793_v16 = vpop.permute.xlu1 %1792 }
 0x4cb   : > { %v1781_v17 = vsel %vm425_vm0, %v1775_v53, %v1779_v58  ;;  %v1783_v13 = vsel %vm425_vm0, %v1779_v58, %v1775_v53  ;;  %v1796_v19 = vsel %vm501_vm1, %v1789_v7, %v1793_v16  ;;  %v1798_v23 = vsel %vm501_vm1, %v1793_v16, %v1789_v7 }
 0x4cc   : > { %v1786_v22 = vmul.f32 %v1783_v13, %v2812_v26  ;;  %v1787_v1 = vmul.f32 %v1781_v17, %v2803_v24  ;;  %v1800_v6 = vmul.f32 %v1798_v23, %v2898_v41  ;;  %v1801_v52 = vmul.f32 %v1796_v19, %v2901_v42 }
 0x4ce   : > { %v2437_v51 = vpack.c.bf16 %v1786_v22, %v1784_v21  ;;  %v1795_v62 = vpop.permute.xlu0 %1794  ;;  %v1809_v40 = vpop.permute.xlu1 %1808  ;;  %v2435_v28 = vpack.c.bf16 %v1787_v1, %v1785_v5 }
 0x4cf   : > { %v1797_v30 = vsel %vm501_vm1, %v1791_v48, %v1795_v62  ;;  %v1799_v2 = vsel %vm501_vm1, %v1795_v62, %v1791_v48  ;;  %v1812_v32 = vsel %vm577_vm2, %v1805_v12, %v1809_v40  ;;  %v1814_v34 = vsel %vm577_vm2, %v1809_v40, %v1805_v12 }
 0x4d0   : > { %v1802_v55 = vmul.f32 %v1799_v2, %v2898_v41  ;;  %v1803_v10 = vmul.f32 %v1797_v30, %v2901_v42  ;;  %2436 = vmatprep.subr.bf16.mxu1 %v2435_v28  ;;  %v1816_v56 = vmul.f32 %v1814_v34, %v2988_v59  ;;  %v1817_v35 = vmul.f32 %v1812_v32, %v2991_v60 }
 0x4d1   : > { %2438 = vmatpush1.bf16.msra.mxu1 %v2437_v51 }
 0x4d2   : > { %v2441_v63 = vpack.c.bf16 %v1802_v55, %v1800_v6  ;;  %v1811_v25 = vpop.permute.xlu0 %1810  ;;  %v1825_v53 = vpop.permute.xlu1 %1824  ;;  %v2439_v7 = vpack.c.bf16 %v1803_v10, %v1801_v52 }
 0x4d3   : > { %v1813_v48 = vsel %vm577_vm2, %v1807_v45, %v1811_v25  ;;  %v1815_v57 = vsel %vm577_vm2, %v1811_v25, %v1807_v45  ;;  %v1828_v12 = vsel %vm653_vm3, %v1821_v54, %v1825_v53  ;;  %v1830_v17 = vsel %vm653_vm3, %v1825_v53, %v1821_v54 }
 0x4d4   : > { %v1818_v58 = vmul.f32 %v1815_v57, %v2988_v59  ;;  %v1819_v16 = vmul.f32 %v1813_v48, %v2991_v60  ;;  %2440 = vmatprep.subr.bf16.mxu1 %v2439_v7  ;;  %v1832_v19 = vmul.f32 %v1830_v17, %v3078_v36  ;;  %v1833_v23 = vmul.f32 %v1828_v12, %v3081_v37 }
 0x4d5   : > { %2442 = vmatpush1.bf16.msra.mxu1 %v2441_v63 }
 0x4d6   : > { %v2445_v13 = vpack.c.bf16 %v1818_v58, %v1816_v56  ;;  %v1827_v21 = vpop.permute.xlu0 %1826  ;;  %v1885_v5 = vpop.permute.xlu1 %1884  ;;  %v2443_v45 = vpack.c.bf16 %v1819_v16, %v1817_v35 }
 0x4d7   : > { %v1829_v22 = vsel %vm653_vm3, %v1823_v33, %v1827_v21  ;;  %v1831_v1 = vsel %vm653_vm3, %v1827_v21, %v1823_v33 }
 0x4d8   : > { %v1834_v51 = vmul.f32 %v1831_v1, %v3078_v36  ;;  %v1835_v62 = vmul.f32 %v1829_v22, %v3081_v37  ;;  %2444 = vmatprep.subr.bf16.mxu1 %v2443_v45 }
 0x4d9   : > { %2446 = vmatpush1.bf16.msra.mxu1 %v2445_v13 }
 0x4da   : > { %v2449_v54 = vpack.c.bf16 %v1834_v51, %v1832_v19  ;;  %v1887_v40 = vpop.permute.xlu0 %1886  ;;  %v1841_v28 = vpop.permute.xlu1 %1840  ;;  %v2447_v30 = vpack.c.bf16 %v1835_v62, %v1833_v23 }
 0x4db   : > { %v1844_v2 = vsel %vm729_vm4, %v4050_v31, %v1841_v28  ;;  %v1846_v33 = vsel %vm729_vm4, %v1841_v28, %v4050_v31 }
 0x4dc   : > { %2448 = vmatprep.subr.bf16.mxu1 %v2447_v30  ;;  %v1848_v32 = vmul.f32 %v1844_v2, %v3213_v29  ;;  %v1849_v34 = vmul.f32 %v1846_v33, %v3197_v27 }
 0x4dd   : > { %2450 = vmatpush1.bf16.msra.mxu1 %v2449_v54 }
 0x4de   : > { %v1843_v6 = vpop.permute.xlu0 %1842  ;;  %2452 = vmatprep.subr.bf16.mxu1 %v2451_v0  ;;  %v1857_v52 = vpop.permute.xlu1 %1856 }
 0x4df   : > { %v1845_v55 = vsel %vm729_vm4, %v4052_v4, %v1843_v6  ;;  %v1847_v10 = vsel %vm729_vm4, %v1843_v6, %v4052_v4  ;;  %v1860_v9 = vsel %vm805_vm5, %v4054_v49, %v1857_v52  ;;  %v1862_v20 = vsel %vm805_vm5, %v1857_v52, %v4054_v49  ;;  %v1900_v6 = vld [vmem:[%s4274_s6] sm:$0xff] }
 0x4e0   : > { %v1850_v31 = vmul.f32 %v1845_v55, %v3213_v29  ;;  %v1851_v63 = vmul.f32 %v1847_v10, %v3197_v27  ;;  %v1864_v57 = vmul.f32 %v1860_v9, %v3289_v38  ;;  %v1865_v49 = vmul.f32 %v1862_v20, %v3292_v39 }
 0x4e1   : > { %2454 = vmatpush1.bf16.msra.mxu1 %v2453_v11 }
 0x4e2   : > { %v2457_v0 = vpack.c.bf16 %v1850_v31, %v1848_v32  ;;  %v1859_v4 = vpop.permute.xlu0 %1858  ;;  %v1873_v25 = vpop.permute.xlu1 %1872  ;;  %v2455_v53 = vpack.c.bf16 %v1851_v63, %v1849_v34 }
 0x4e3   : > { %v1861_v7 = vsel %vm805_vm5, %v4056_v46, %v1859_v4  ;;  %v1863_v48 = vsel %vm805_vm5, %v1859_v4, %v4056_v46  ;;  %v1876_v15 = vsel %vm881_vm6, %v4058_v47, %v1873_v25  ;;  %v1878_v11 = vsel %vm881_vm6, %v1873_v25, %v4058_v47 }
 0x4e4   : > { %v1866_v56 = vmul.f32 %v1861_v7, %v3289_v38  ;;  %v1867_v43 = vmul.f32 %v1863_v48, %v3292_v39  ;;  %2456 = vmatprep.subr.bf16.mxu1 %v2455_v53  ;;  %v1880_v13 = vmul.f32 %v1876_v15, %v4290_v3  ;;  %v1881_v21 = vmul.f32 %v1878_v11, %v3350_v50 }
 0x4e5   : > { %2458 = vmatpush1.bf16.msra.mxu1 %v2457_v0 }
 0x4e6   : > { %v2461_v35 = vpack.c.bf16 %v1866_v56, %v1864_v57  ;;  %v1875_v46 = vpop.permute.xlu0 %1874  ;;  %v1889_v58 = vpop.permute.xlu1 %1888  ;;  %v2459_v16 = vpack.c.bf16 %v1867_v43, %v1865_v49 }
 0x4e7   : > { %v1877_v12 = vsel %vm881_vm6, %v4060_v8, %v1875_v46  ;;  %v1879_v17 = vsel %vm881_vm6, %v1875_v46, %v4060_v8  ;;  %v1892_v22 = vsel %vm957_vm7, %v1885_v5, %v1889_v58  ;;  %v1894_v1 = vsel %vm957_vm7, %v1889_v58, %v1885_v5 }
 0x4e8   : > { %v1882_v45 = vmul.f32 %v1877_v12, %v4290_v3  ;;  %v1883_v47 = vmul.f32 %v1879_v17, %v3350_v50  ;;  %2460 = vmatprep.subr.bf16.mxu1 %v2459_v16  ;;  %v1896_v54 = vmul.f32 %v1892_v22, %v4292_v61  ;;  %v1897_v28 = vmul.f32 %v1894_v1, %v4291_v14 }
 0x4e9   : > { %2462 = vmatpush1.bf16.msra.mxu1 %v2461_v35 }
 0x4ea   : > { %v2465_v19 = vpack.c.bf16 %v1882_v45, %v1880_v13  ;;  %v1891_v23 = vpop.permute.xlu0 %1890  ;;  %v2463_v51 = vpack.c.bf16 %v1883_v47, %v1881_v21 }
 0x4eb   : > { %v1893_v8 = vsel %vm957_vm7, %v1887_v40, %v1891_v23  ;;  %v1895_v62 = vsel %vm957_vm7, %v1891_v23, %v1887_v40 }
 0x4ec   : > { %v1898_v30 = vmul.f32 %v1893_v8, %v4292_v61  ;;  %v1899_v2 = vmul.f32 %v1895_v62, %v4291_v14  ;;  %2464 = vmatprep.subr.bf16.mxu1 %v2463_v51 }
 0x4ed   : > { %2466 = vmatpush1.bf16.msra.mxu1 %v2465_v19 }
 0x4ee   : > { %v2469_v5 = vpack.c.bf16 %v1898_v30, %v1896_v54  ;;  %v2467_v33 = vpack.c.bf16 %v1899_v2, %v1897_v28 }
 0x4f0   : > { %2468 = vmatprep.subr.bf16.mxu1 %v2467_v33 }
 0x4f1   : > { %2470 = vmatpush1.bf16.msra.mxu1 %v2469_v5 }
 0x4f4   : > { %1977 = vmatmul.mubr.f32.vlgmr.msra.gmra.mrb[12].mxu1 %v1900_v6 }
 0x4f5   : > { %2124 = vmatprep.mubr.f32.mxu1 %v4293_v44  ;;  %v2050_v44 = vld [vmem:[%s4277_s9] sm:$0x7] }
 0x4f7   : > { %v1906_v40 = vpop.permute.xlu1 %1905 }
 0x5c7   : > { %v1978_v52 = vpop.f32.mrb[12].mxu1 }
 0x5c8   : > { %v1979_v55 = vadd.f32 %v1978_v52, %v1906_v40  ;;  %v1980_v10 = vpop.f32.mrb[13].mxu1 }
 0x5c9   : > { %v1981_v32 = vadd.f32 %v1980_v10, %v1906_v40 }
 0x5ca   : > { %v4180_v34 = vmax.f32 %v1979_v55, 0.0 }
 0x5cb   : > { %v1984_v31 = vmax.f32 %v1981_v32, 0.0 }
 0x5cc   : > { %1985 = vrot.lane.b32.xlu0 %v4180_v34, %s2547_s19 }
 0x5cd   : > { %1987 = vrot.lane.b32.xlu1 %v1984_v31, %s2547_s19 }
 0x5d0   : > { %1993 = vrot.lane.b32.xlu0 %v4180_v34, %s2548_s20 }
 0x5d1   : > { %1995 = vrot.lane.b32.xlu1 %v1984_v31, %s2548_s20 }
 0x5d4   : > { %2001 = vrot.lane.b32.xlu0 %v4180_v34, %s2549_s21 }
 0x5d5   : > { %2003 = vrot.lane.b32.xlu1 %v1984_v31, %s2549_s21 }
 0x5d8   : > { %2009 = vrot.lane.b32.xlu0 %v4180_v34, %s2550_s22 }
 0x5d9   : > { %2011 = vrot.lane.b32.xlu1 %v1984_v31, %s2550_s22 }
 0x5dc   : > { %2017 = vrot.lane.b32.xlu0 %v4180_v34, %s2551_s27 }
 0x5dd   : > { %2019 = vrot.lane.b32.xlu1 %v1984_v31, %s2551_s27  ;;  %s2218_s27 = sshll.u32 %s4295_s14, 3 }
 0x5e0   : > { %2025 = vrot.lane.b32.xlu0 %v4180_v34, %s2552_s30 }
 0x5e1   : > { %2027 = vrot.lane.b32.xlu1 %v1984_v31, %s2552_s30 }
 0x5e4   : > { %2033 = vrot.lane.b32.xlu0 %v4180_v34, %s2553_s15 }
 0x5e5   : > { %2035 = vrot.lane.b32.xlu1 %v1984_v31, %s2553_s15 }
 0x5e8   : > { %2041 = vrot.lane.b32.xlu0 %v4180_v34, %s2554_s16 }
 0x5e9   : > { %2043 = vrot.lane.b32.xlu1 %v1984_v31, %s2554_s16  ;;  %s359_s16 = scalar_lea.vmem %s4278_s10, %s2218_s27 }
 0x5ec   : > { %2053 = vperm.xlu0 %2537, %v2050_v44  }
 0x63e   : > { %v1986_v63 = vpop.permute.xlu0 %1985 }
 0x63f   : > { %v1988_v9 = vpop.permute.xlu1 %1987 }
 0x640   : > { %v1989_v20 = vsel %vm425_vm0, %v1986_v63, %v1988_v9  ;;  %v1990_v0 = vsel %vm425_vm0, %v1988_v9, %v1986_v63 }
 0x641   : > { %v1991_v48 = vmul.f32 %v1990_v0, %v2812_v26  ;;  %v1992_v57 = vmul.f32 %v1989_v20, %v2803_v24 }
 0x642   : > { %v1994_v4 = vpop.permute.xlu0 %1993 }
 0x643   : > { %v1996_v25 = vpop.permute.xlu1 %1995 }
 0x644   : > { %v1997_v53 = vsel %vm501_vm1, %v1994_v4, %v1996_v25  ;;  %v1998_v7 = vsel %vm501_vm1, %v1996_v25, %v1994_v4 }
 0x645   : > { %v1999_v49 = vmul.f32 %v1998_v7, %v2898_v41  ;;  %v2000_v56 = vmul.f32 %v1997_v53, %v2901_v42 }
 0x646   : > { %v2002_v43 = vpop.permute.xlu0 %2001 }
 0x647   : > { %v2473_v15 = vpack.c.bf16 %v1999_v49, %v1991_v48  ;;  %v2004_v11 = vpop.permute.xlu1 %2003  ;;  %v2471_v35 = vpack.c.bf16 %v2000_v56, %v1992_v57 }
 0x648   : > { %v2005_v46 = vsel %vm577_vm2, %v2002_v43, %v2004_v11  ;;  %v2006_v58 = vsel %vm577_vm2, %v2004_v11, %v2002_v43 }
 0x649   : > { %2472 = vmatprep.subr.bf16.mxu1 %v2471_v35  ;;  %v2007_v42 = vmul.f32 %v2006_v58, %v2988_v59  ;;  %v2008_v12 = vmul.f32 %v2005_v46, %v2991_v60 }
 0x64a   : > { %2474 = vmatpush1.bf16.msra.mxu1 %v2473_v15  ;;  %v2010_v16 = vpop.permute.xlu0 %2009 }
 0x64b   : > { %v2012_v26 = vpop.permute.xlu1 %2011 }
 0x64c   : > { %v2013_v24 = vsel %vm653_vm3, %v2010_v16, %v2012_v26  ;;  %v2014_v41 = vsel %vm653_vm3, %v2012_v26, %v2010_v16 }
 0x64d   : > { %v2015_v17 = vmul.f32 %v2014_v41, %v3078_v36  ;;  %v2016_v13 = vmul.f32 %v2013_v24, %v3081_v37 }
 0x64e   : > { %v2018_v21 = vpop.permute.xlu0 %2017 }
 0x64f   : > { %v2477_v45 = vpack.c.bf16 %v2015_v17, %v2007_v42  ;;  %v2020_v47 = vpop.permute.xlu1 %2019  ;;  %v2475_v22 = vpack.c.bf16 %v2016_v13, %v2008_v12 }
 0x650   : > { %v2021_v1 = vsel %vm729_vm4, %v2018_v21, %v2020_v47  ;;  %v2022_v19 = vsel %vm729_vm4, %v2020_v47, %v2018_v21 }
 0x651   : > { %v2023_v23 = vmul.f32 %v2021_v1, %v3213_v29  ;;  %v2024_v59 = vmul.f32 %v2022_v19, %v3197_v27  ;;  %2476 = vmatprep.subr.bf16.mxu1 %v2475_v22 }
 0x652   : > { %2478 = vmatpush1.bf16.msra.mxu1 %v2477_v45  ;;  %v2026_v60 = vpop.permute.xlu0 %2025 }
 0x653   : > { %v2481_v36 = vpack.c.bf16 %v2023_v23, %v4180_v34  ;;  %v2028_v37 = vpop.permute.xlu1 %2027  ;;  %v2479_v51 = vpack.c.bf16 %v2024_v59, %v1984_v31 }
 0x654   : > { %v2029_v8 = vsel %vm805_vm5, %v2026_v60, %v2028_v37  ;;  %v2030_v62 = vsel %vm805_vm5, %v2028_v37, %v2026_v60 }
 0x655   : > { %2480 = vmatprep.subr.bf16.mxu1 %v2479_v51  ;;  %v2031_v30 = vmul.f32 %v2029_v8, %v3289_v38  ;;  %v2032_v2 = vmul.f32 %v2030_v62, %v3292_v39  ;;  %v2049_v39 = vld [vmem:[%s4276_s8] sm:$0x7] }
 0x656   : > { %2482 = vmatpush1.bf16.msra.mxu1 %v2481_v36  ;;  %v2034_v54 = vpop.permute.xlu0 %2033 }
 0x657   : > { %v2036_v28 = vpop.permute.xlu1 %2035 }
 0x658   : > { %v2037_v27 = vsel %vm881_vm6, %v2034_v54, %v2036_v28  ;;  %v2038_v29 = vsel %vm881_vm6, %v2036_v28, %v2034_v54 }
 0x659   : > { %v2039_v5 = vmul.f32 %v2037_v27, %v4290_v3  ;;  %v2040_v33 = vmul.f32 %v2038_v29, %v3350_v50 }
 0x65a   : > { %v2042_v6 = vpop.permute.xlu0 %2041 }
 0x65b   : > { %v2485_v40 = vpack.c.bf16 %v2039_v5, %v2031_v30  ;;  %v2044_v52 = vpop.permute.xlu1 %2043  ;;  %v2483_v55 = vpack.c.bf16 %v2040_v33, %v2032_v2 }
 0x65c   : > { %v2046_v10 = vsel %vm957_vm7, %v2044_v52, %v2042_v6  ;;  %v2045_v32 = vsel %vm957_vm7, %v2042_v6, %v2044_v52 }
 0x65d   : > { %v2048_v34 = vmul.f32 %v2046_v10, %v4291_v14  ;;  %2484 = vmatprep.subr.bf16.mxu1 %v2483_v55  ;;  %v2047_v38 = vmul.f32 %v2045_v32, %v4292_v61 }
 0x65e   : > { %2486 = vmatpush1.bf16.msra.mxu1 %v2485_v40 }
 0x65f   : > { %2076 = vmatprep.subr.mxu1 %v2048_v34 }
 0x662   : > { %2077 = vmatpush1.msra.mxu1 %v2047_v38 }
 0x663   : > { %2214 = vmatmul.mubr.msk.f32.vlgmr.msra.gmra.mrb[14].mxu1 %vm2056_vm11, %v2049_v39 }
 0x66b   : > { %v2054_v50 = vpop.permute.xlu0 %2053 }
 0x736   : > { %v2126_v3 = vpop.f32.mrb[14].mxu1 }
 0x737   : > { %v2127_v31 = vadd.f32 %v2126_v3, %v2054_v50  ;;  %v2128_v18 = vpop.f32.mrb[15].mxu1 }
 0x738   : > { %v2129_v44 = vadd.f32 %v2128_v18, %v2054_v50 }
 0x73a   : > { %v2133_v14 = vcombine.low %v2127_v31, %v2129_v44 }
 0x73c   : > { %2135 = vst [vmem:[%s359_s16] sm:$0x77] %v2133_v14 }
 0x73d PF: > { %s20_s13 = sadd.s32 1, %s2545_s13  }
 0x73e   : > { %p17_p4 = scmp.ge.s32.totalorder %s20_s13, 4  }
 0x740   :  { %19 = sbr.rel (!%p17_p4) target bundleno = 1 (0x1), region = 97 }

</bundles_post_ra>
